<compile_context>
chip_gen: v5e
topology: v5e:2x2
jax: 0.10.0
libtpu: 0.0.40
codegen_flags: <defaults>
</compile_context>

<pallas_src>
import jax
import jax.numpy as jnp
from jax import lax
from jax.experimental import pallas as pl
from jax.experimental.pallas import tpu as pltpu


def bottleneck_kernel(x_ref, w1_ref, s1_ref, b1_ref,
                      w2_ref, s2_ref, b2_ref,
                      w3_ref, s3_ref, b3_ref,
                      o_ref, pad_ref):
    """Whole batch in one invocation.

    x_ref   : (M, Cin)            flattened NHWC input, M = N*H*W (identity path)
    w1_ref  : (Cin, Cmid)         1x1 conv as matmul
    w2_ref  : (9, Cmid, Cmid)     3x3 conv, one (Cin, Cout) matrix per tap
    w3_ref  : (Cmid, Cexp)        1x1 conv as matmul
    s*/b*   : (1, C)              folded BatchNorm scale / bias
    o_ref   : (M, Cexp)           flattened NHWC output
    pad_ref : (N, H+2, W+2, Cmid) VMEM scratch supplying conv2's zero padding
    """
    N, Hp, Wp, Cmid = pad_ref.shape
    H, W = Hp - 2, Wp - 2
    M = N * H * W

    x = x_ref[...]                                                  # (M, Cin)

    # conv1 (1x1) + bn1 + relu: one whole-batch matmul (M rows on the MXU).
    y1 = jnp.dot(x, w1_ref[...], preferred_element_type=jnp.float32)
    y1 = jnp.maximum(y1 * s1_ref[...] + b1_ref[...], 0.0)           # (M, Cmid)

    # Zero-padded scratch for conv2: zero once, one bulk interior store.
    pad_ref[...] = jnp.zeros_like(pad_ref)
    pad_ref[:, 1:H + 1, 1:W + 1, :] = y1.reshape(N, H, W, Cmid)

    # conv2 (3x3, stride 1, pad 1) + bn2 + relu: 9 shifted whole-batch matmuls.
    w2 = w2_ref[...]                                                # (9, Cmid, Cmid)
    acc = jnp.zeros((M, Cmid), jnp.float32)
    for dy in range(3):
        for dx in range(3):
            win = pad_ref[:, dy:dy + H, dx:dx + W, :]               # (N, H, W, Cmid)
            acc = acc + jnp.dot(win.reshape(M, Cmid), w2[dy * 3 + dx],
                                preferred_element_type=jnp.float32)
    y2 = jnp.maximum(acc * s2_ref[...] + b2_ref[...], 0.0)          # (M, Cmid)

    # conv3 (1x1) + bn3 + identity residual + final relu: one matmul, one store.
    y3 = jnp.dot(y2, w3_ref[...], preferred_element_type=jnp.float32)
    y3 = y3 * s3_ref[...] + b3_ref[...] + x                         # (M, Cexp)
    o_ref[...] = jnp.maximum(y3, 0.0)


def bottleneck_pallas(x_nchw, params):
    w1, s1, b1, w2, s2, b2, w3, s3, b3 = params
    N, Cin, H, W = x_nchw.shape
    Cmid = w1.shape[1]
    Cexp = w3.shape[1]
    assert Cin == Cexp, "identity residual requires in_channel == out_channel*4"

    # NCHW -> NHWC -> (N*H*W, Cin): channels on the lane axis, batch + spatial
    # folded into the matmul M dimension so the whole problem is one grid step
    # (input + output + weights + scratch are a few tens of KiB -> VMEM fits
    # trivially on every generation, no tiling needed at these shapes).
    x_flat = jnp.transpose(x_nchw, (0, 2, 3, 1)).astype(jnp.float32)
    x_flat = x_flat.reshape(N * H * W, Cin)

    def full_spec(a):
        nd = a.ndim
        return pl.BlockSpec(a.shape, lambda i, _nd=nd: (0,) * _nd)

    out_flat = pl.pallas_call(
        bottleneck_kernel,
        out_shape=jax.ShapeDtypeStruct((N * H * W, Cexp), jnp.float32),
        grid_spec=pltpu.PrefetchScalarGridSpec(
            num_scalar_prefetch=0,
            grid=(1,),
            in_specs=[full_spec(a) for a in
                      (x_flat, w1, s1, b1, w2, s2, b2, w3, s3, b3)],
            out_specs=pl.BlockSpec((N * H * W, Cexp), lambda i: (0, 0)),
            scratch_shapes=[pltpu.VMEM((N, H + 2, W + 2, Cmid), jnp.float32)],
        ),
        compiler_params=pltpu.CompilerParams(
            dimension_semantics=("arbitrary",)),
    )(x_flat, w1, s1, b1, w2, s2, b2, w3, s3, b3)

    out = out_flat.reshape(N, H, W, Cexp)
    return jnp.transpose(out, (0, 3, 1, 2))                         # NHWC -> NCHW


def init_params(key, in_channel, out_channel, expansion=4, eps=1e-5):
    """Deterministic synthetic parameters (PyTorch shapes), pre-folded for the kernel."""
    cexp = out_channel * expansion
    ks = jax.random.split(key, 15)

    # Conv weights in PyTorch (out, in, kh, kw) layout, kaiming-ish scaling.
    wc1 = jax.random.normal(ks[0], (out_channel, in_channel, 1, 1),
                            jnp.float32) * (2.0 / in_channel) ** 0.5
    wc2 = jax.random.normal(ks[1], (out_channel, out_channel, 3, 3),
                            jnp.float32) * (2.0 / (9 * out_channel)) ** 0.5
    wc3 = jax.random.normal(ks[2], (cexp, out_channel, 1, 1),
                            jnp.float32) * (2.0 / out_channel) ** 0.5

    def bn_fold(kg, kb, km, kv, c):
        gamma = 1.0 + 0.1 * jax.random.normal(kg, (c,), jnp.float32)
        beta = 0.1 * jax.random.normal(kb, (c,), jnp.float32)
        mean = 0.1 * jax.random.normal(km, (c,), jnp.float32)
        var = jax.random.uniform(kv, (c,), jnp.float32, minval=0.5, maxval=1.5)
        scale = gamma / jnp.sqrt(var + eps)
        bias = beta - mean * scale
        return scale.reshape(1, c), bias.reshape(1, c)

    s1, b1 = bn_fold(ks[3], ks[4], ks[5], ks[6], out_channel)
    s2, b2 = bn_fold(ks[7], ks[8], ks[9], ks[10], out_channel)
    s3, b3 = bn_fold(ks[11], ks[12], ks[13], ks[14], cexp)

    # Matmul-form weights for the kernel.
    w1 = wc1[:, :, 0, 0].T                                          # (Cin, Cmid)
    w2 = jnp.transpose(wc2, (2, 3, 1, 0)).reshape(9, out_channel, out_channel)
    w3 = wc3[:, :, 0, 0].T                                          # (Cmid, Cexp)

    raw = (wc1, wc2, wc3)
    folded = (w1, s1, b1, w2, s2, b2, w3, s3, b3)
    return folded, raw


def bottleneck_ref(x_nchw, folded, raw):
    """Pure-JAX reference (NHWC) matching the PyTorch forward (inference BN)."""
    w1, s1, b1, w2, s2, b2, w3, s3, b3 = folded
    _, wc2, _ = raw
    x = jnp.transpose(x_nchw, (0, 2, 3, 1)).astype(jnp.float32)     # NHWC
    identity = x

    y = jnp.einsum('nhwi,io->nhwo', x, w1)
    y = jnp.maximum(y * s1 + b1, 0.0)

    w2_hwio = jnp.transpose(wc2, (2, 3, 1, 0))                      # (3,3,Cmid,Cmid)
    y = lax.conv_general_dilated(
        y, w2_hwio, window_strides=(1, 1), padding='SAME',
        dimension_numbers=('NHWC', 'HWIO', 'NHWC'))
    y = jnp.maximum(y * s2 + b2, 0.0)

    y = jnp.einsum('nhwi,io->nhwo', y, w3)
    y = y * s3 + b3 + identity
    y = jnp.maximum(y, 0.0)
    return jnp.transpose(y, (0, 3, 1, 2))                           # back to NCHW


if __name__ == "__main__":
    key = jax.random.PRNGKey(0)
    kx, kp = jax.random.split(key)

    # Bottleneck(in_channel=16, out_channel=4, stride=1, downsample=None)
    in_channel, out_channel = 16, 4
    N, H, W = 2, 8, 8

    x = jax.random.normal(kx, (N, in_channel, H, W), jnp.float32)   # PyTorch NCHW
    folded, raw = init_params(kp, in_channel, out_channel)

    out = bottleneck_pallas(x, folded)
    out = jax.block_until_ready(out)

    ref = bottleneck_ref(x, folded, raw)
    max_err = float(jnp.max(jnp.abs(out - ref)))
    assert out.shape == (N, in_channel, H, W)
    assert max_err < 1e-3, f"mismatch vs reference: {max_err}"

    print("KERNEL_OK")
</pallas_src>

<mosaic_0001>
module attributes {stable_mosaic.version = 11 : i64} {
  func.func @bottleneck_kernel(%arg0: i32, %arg1: memref<128x16xf32, #tpu.memory_space<vmem>>, %arg2: memref<16x4xf32, #tpu.memory_space<vmem>>, %arg3: memref<1x4xf32, #tpu.memory_space<vmem>>, %arg4: memref<1x4xf32, #tpu.memory_space<vmem>>, %arg5: memref<9x4x4xf32, #tpu.memory_space<vmem>>, %arg6: memref<1x4xf32, #tpu.memory_space<vmem>>, %arg7: memref<1x4xf32, #tpu.memory_space<vmem>>, %arg8: memref<4x16xf32, #tpu.memory_space<vmem>>, %arg9: memref<1x16xf32, #tpu.memory_space<vmem>>, %arg10: memref<1x16xf32, #tpu.memory_space<vmem>>, %arg11: memref<128x16xf32, #tpu.memory_space<vmem>>, %arg12: memref<2x10x10x4xf32, #tpu.memory_space<vmem>>) attributes {dimension_semantics = [#tpu.dimension_semantics<arbitrary>], iteration_bounds = array<i64: 1>, scalar_prefetch = 0 : i64, scratch_operands = 1 : i64, tpu.core_type = #tpu.core_type<tc>, window_params = [{pipeline_mode = #tpu.pipeline_mode<synchronous>, transform_indices = @transform_0, window_bounds = array<i64: 128, 16>}, {pipeline_mode = #tpu.pipeline_mode<synchronous>, transform_indices = @transform_1, window_bounds = array<i64: 16, 4>}, {pipeline_mode = #tpu.pipeline_mode<synchronous>, transform_indices = @transform_2, window_bounds = array<i64: 1, 4>}, {pipeline_mode = #tpu.pipeline_mode<synchronous>, transform_indices = @transform_3, window_bounds = array<i64: 1, 4>}, {pipeline_mode = #tpu.pipeline_mode<synchronous>, transform_indices = @transform_4, window_bounds = array<i64: 9, 4, 4>}, {pipeline_mode = #tpu.pipeline_mode<synchronous>, transform_indices = @transform_5, window_bounds = array<i64: 1, 4>}, {pipeline_mode = #tpu.pipeline_mode<synchronous>, transform_indices = @transform_6, window_bounds = array<i64: 1, 4>}, {pipeline_mode = #tpu.pipeline_mode<synchronous>, transform_indices = @transform_7, window_bounds = array<i64: 4, 16>}, {pipeline_mode = #tpu.pipeline_mode<synchronous>, transform_indices = @transform_8, window_bounds = array<i64: 1, 16>}, {pipeline_mode = #tpu.pipeline_mode<synchronous>, transform_indices = @transform_9, window_bounds = array<i64: 1, 16>}, {pipeline_mode = #tpu.pipeline_mode<synchronous>, transform_indices = @transform_10, window_bounds = array<i64: 128, 16>}]} {
    %c0 = arith.constant 0 : index
    %c0_0 = arith.constant 0 : index
    %0 = vector.load %arg1[%c0, %c0_0] : memref<128x16xf32, #tpu.memory_space<vmem>>, vector<128x16xf32>
    %c0_1 = arith.constant 0 : index
    %c0_2 = arith.constant 0 : index
    %1 = vector.load %arg2[%c0_1, %c0_2] : memref<16x4xf32, #tpu.memory_space<vmem>>, vector<16x4xf32>
    %cst = arith.constant dense<0.000000e+00> : vector<128x4xf32>
    %2 = tpu.matmul %0, %1, %cst {dimension_numbers = #tpu.dot_dimension_numbers<[1], [0], [0], [1], [0, 0, 1, 1], [], []>} : vector<128x16xf32>, vector<16x4xf32>, vector<128x4xf32> -> vector<128x4xf32>
    %c0_3 = arith.constant 0 : index
    %c0_4 = arith.constant 0 : index
    %3 = vector.load %arg3[%c0_3, %c0_4] : memref<1x4xf32, #tpu.memory_space<vmem>>, vector<1x4xf32>
    %4 = vector.broadcast %3 : vector<1x4xf32> to vector<128x4xf32>
    %5 = arith.mulf %2, %4 : vector<128x4xf32>
    %c0_5 = arith.constant 0 : index
    %c0_6 = arith.constant 0 : index
    %6 = vector.load %arg4[%c0_5, %c0_6] : memref<1x4xf32, #tpu.memory_space<vmem>>, vector<1x4xf32>
    %7 = vector.broadcast %6 : vector<1x4xf32> to vector<128x4xf32>
    %8 = arith.addf %5, %7 : vector<128x4xf32>
    %cst_7 = arith.constant 0.000000e+00 : f32
    %9 = vector.broadcast %cst_7 : f32 to vector<128x4xf32>
    %10 = arith.maximumf %8, %9 : vector<128x4xf32>
    %cst_8 = arith.constant 0.000000e+00 : f32
    %11 = vector.broadcast %cst_8 : f32 to vector<2x10x10x4xf32>
    %c0_9 = arith.constant 0 : index
    %c0_10 = arith.constant 0 : index
    %c0_11 = arith.constant 0 : index
    %c0_12 = arith.constant 0 : index
    %12 = vector.load %arg12[%c0_9, %c0_10, %c0_11, %c0_12] : memref<2x10x10x4xf32, #tpu.memory_space<vmem>>, vector<2x10x10x4xf32>
    tpu.vector_store %arg12[%c0_9, %c0_10, %c0_11, %c0_12], %11 {strides = array<i32>} : memref<2x10x10x4xf32, #tpu.memory_space<vmem>>, vector<2x10x10x4xf32>,
    %13 = vector.shape_cast %10 : vector<128x4xf32> to vector<2x8x8x4xf32>
    %c0_13 = arith.constant 0 : index
    %c1 = arith.constant 1 : index
    %c1_14 = arith.constant 1 : index
    %c0_15 = arith.constant 0 : index
    %14 = vector.load %arg12[%c0_13, %c1, %c1_14, %c0_15] : memref<2x10x10x4xf32, #tpu.memory_space<vmem>>, vector<2x8x8x4xf32>
    tpu.vector_store %arg12[%c0_13, %c1, %c1_14, %c0_15], %13 {strides = array<i32>} : memref<2x10x10x4xf32, #tpu.memory_space<vmem>>, vector<2x8x8x4xf32>,
    %c0_16 = arith.constant 0 : index
    %c0_17 = arith.constant 0 : index
    %c0_18 = arith.constant 0 : index
    %15 = vector.load %arg5[%c0_16, %c0_17, %c0_18] : memref<9x4x4xf32, #tpu.memory_space<vmem>>, vector<9x4x4xf32>
    %cst_19 = arith.constant 0.000000e+00 : f32
    %16 = vector.broadcast %cst_19 : f32 to vector<128x4xf32>
    %c0_20 = arith.constant 0 : index
    %c0_21 = arith.constant 0 : index
    %c0_22 = arith.constant 0 : index
    %c0_23 = arith.constant 0 : index
    %17 = vector.load %arg12[%c0_20, %c0_21, %c0_22, %c0_23] : memref<2x10x10x4xf32, #tpu.memory_space<vmem>>, vector<2x8x8x4xf32>
    %18 = vector.shape_cast %17 : vector<2x8x8x4xf32> to vector<128x4xf32>
    %19 = vector.extract_strided_slice %15 {offsets = [0, 0, 0], sizes = [1, 4, 4], strides = [1, 1, 1]} : vector<9x4x4xf32> to vector<1x4x4xf32>
    %20 = vector.shape_cast %19 : vector<1x4x4xf32> to vector<4x4xf32>
    %cst_24 = arith.constant dense<0.000000e+00> : vector<128x4xf32>
    %21 = tpu.matmul %18, %20, %cst_24 {dimension_numbers = #tpu.dot_dimension_numbers<[1], [0], [0], [1], [0, 0, 1, 1], [], []>} : vector<128x4xf32>, vector<4x4xf32>, vector<128x4xf32> -> vector<128x4xf32>
    %22 = arith.addf %16, %21 : vector<128x4xf32>
    %c0_25 = arith.constant 0 : index
    %c0_26 = arith.constant 0 : index
    %c1_27 = arith.constant 1 : index
    %c0_28 = arith.constant 0 : index
    %23 = vector.load %arg12[%c0_25, %c0_26, %c1_27, %c0_28] : memref<2x10x10x4xf32, #tpu.memory_space<vmem>>, vector<2x8x8x4xf32>
    %24 = vector.shape_cast %23 : vector<2x8x8x4xf32> to vector<128x4xf32>
    %25 = vector.extract_strided_slice %15 {offsets = [1, 0, 0], sizes = [1, 4, 4], strides = [1, 1, 1]} : vector<9x4x4xf32> to vector<1x4x4xf32>
    %26 = vector.shape_cast %25 : vector<1x4x4xf32> to vector<4x4xf32>
    %cst_29 = arith.constant dense<0.000000e+00> : vector<128x4xf32>
    %27 = tpu.matmul %24, %26, %cst_29 {dimension_numbers = #tpu.dot_dimension_numbers<[1], [0], [0], [1], [0, 0, 1, 1], [], []>} : vector<128x4xf32>, vector<4x4xf32>, vector<128x4xf32> -> vector<128x4xf32>
    %28 = arith.addf %22, %27 : vector<128x4xf32>
    %c0_30 = arith.constant 0 : index
    %c0_31 = arith.constant 0 : index
    %c2 = arith.constant 2 : index
    %c0_32 = arith.constant 0 : index
    %29 = vector.load %arg12[%c0_30, %c0_31, %c2, %c0_32] : memref<2x10x10x4xf32, #tpu.memory_space<vmem>>, vector<2x8x8x4xf32>
    %30 = vector.shape_cast %29 : vector<2x8x8x4xf32> to vector<128x4xf32>
    %31 = vector.extract_strided_slice %15 {offsets = [2, 0, 0], sizes = [1, 4, 4], strides = [1, 1, 1]} : vector<9x4x4xf32> to vector<1x4x4xf32>
    %32 = vector.shape_cast %31 : vector<1x4x4xf32> to vector<4x4xf32>
    %cst_33 = arith.constant dense<0.000000e+00> : vector<128x4xf32>
    %33 = tpu.matmul %30, %32, %cst_33 {dimension_numbers = #tpu.dot_dimension_numbers<[1], [0], [0], [1], [0, 0, 1, 1], [], []>} : vector<128x4xf32>, vector<4x4xf32>, vector<128x4xf32> -> vector<128x4xf32>
    %34 = arith.addf %28, %33 : vector<128x4xf32>
    %c0_34 = arith.constant 0 : index
    %c1_35 = arith.constant 1 : index
    %c0_36 = arith.constant 0 : index
    %c0_37 = arith.constant 0 : index
    %35 = vector.load %arg12[%c0_34, %c1_35, %c0_36, %c0_37] : memref<2x10x10x4xf32, #tpu.memory_space<vmem>>, vector<2x8x8x4xf32>
    %36 = vector.shape_cast %35 : vector<2x8x8x4xf32> to vector<128x4xf32>
    %37 = vector.extract_strided_slice %15 {offsets = [3, 0, 0], sizes = [1, 4, 4], strides = [1, 1, 1]} : vector<9x4x4xf32> to vector<1x4x4xf32>
    %38 = vector.shape_cast %37 : vector<1x4x4xf32> to vector<4x4xf32>
    %cst_38 = arith.constant dense<0.000000e+00> : vector<128x4xf32>
    %39 = tpu.matmul %36, %38, %cst_38 {dimension_numbers = #tpu.dot_dimension_numbers<[1], [0], [0], [1], [0, 0, 1, 1], [], []>} : vector<128x4xf32>, vector<4x4xf32>, vector<128x4xf32> -> vector<128x4xf32>
    %40 = arith.addf %34, %39 : vector<128x4xf32>
    %c0_39 = arith.constant 0 : index
    %c1_40 = arith.constant 1 : index
    %c1_41 = arith.constant 1 : index
    %c0_42 = arith.constant 0 : index
    %41 = vector.load %arg12[%c0_39, %c1_40, %c1_41, %c0_42] : memref<2x10x10x4xf32, #tpu.memory_space<vmem>>, vector<2x8x8x4xf32>
    %42 = vector.shape_cast %41 : vector<2x8x8x4xf32> to vector<128x4xf32>
    %43 = vector.extract_strided_slice %15 {offsets = [4, 0, 0], sizes = [1, 4, 4], strides = [1, 1, 1]} : vector<9x4x4xf32> to vector<1x4x4xf32>
    %44 = vector.shape_cast %43 : vector<1x4x4xf32> to vector<4x4xf32>
    %cst_43 = arith.constant dense<0.000000e+00> : vector<128x4xf32>
    %45 = tpu.matmul %42, %44, %cst_43 {dimension_numbers = #tpu.dot_dimension_numbers<[1], [0], [0], [1], [0, 0, 1, 1], [], []>} : vector<128x4xf32>, vector<4x4xf32>, vector<128x4xf32> -> vector<128x4xf32>
    %46 = arith.addf %40, %45 : vector<128x4xf32>
    %c0_44 = arith.constant 0 : index
    %c1_45 = arith.constant 1 : index
    %c2_46 = arith.constant 2 : index
    %c0_47 = arith.constant 0 : index
    %47 = vector.load %arg12[%c0_44, %c1_45, %c2_46, %c0_47] : memref<2x10x10x4xf32, #tpu.memory_space<vmem>>, vector<2x8x8x4xf32>
    %48 = vector.shape_cast %47 : vector<2x8x8x4xf32> to vector<128x4xf32>
    %49 = vector.extract_strided_slice %15 {offsets = [5, 0, 0], sizes = [1, 4, 4], strides = [1, 1, 1]} : vector<9x4x4xf32> to vector<1x4x4xf32>
    %50 = vector.shape_cast %49 : vector<1x4x4xf32> to vector<4x4xf32>
    %cst_48 = arith.constant dense<0.000000e+00> : vector<128x4xf32>
    %51 = tpu.matmul %48, %50, %cst_48 {dimension_numbers = #tpu.dot_dimension_numbers<[1], [0], [0], [1], [0, 0, 1, 1], [], []>} : vector<128x4xf32>, vector<4x4xf32>, vector<128x4xf32> -> vector<128x4xf32>
    %52 = arith.addf %46, %51 : vector<128x4xf32>
    %c0_49 = arith.constant 0 : index
    %c2_50 = arith.constant 2 : index
    %c0_51 = arith.constant 0 : index
    %c0_52 = arith.constant 0 : index
    %53 = vector.load %arg12[%c0_49, %c2_50, %c0_51, %c0_52] : memref<2x10x10x4xf32, #tpu.memory_space<vmem>>, vector<2x8x8x4xf32>
    %54 = vector.shape_cast %53 : vector<2x8x8x4xf32> to vector<128x4xf32>
    %55 = vector.extract_strided_slice %15 {offsets = [6, 0, 0], sizes = [1, 4, 4], strides = [1, 1, 1]} : vector<9x4x4xf32> to vector<1x4x4xf32>
    %56 = vector.shape_cast %55 : vector<1x4x4xf32> to vector<4x4xf32>
    %cst_53 = arith.constant dense<0.000000e+00> : vector<128x4xf32>
    %57 = tpu.matmul %54, %56, %cst_53 {dimension_numbers = #tpu.dot_dimension_numbers<[1], [0], [0], [1], [0, 0, 1, 1], [], []>} : vector<128x4xf32>, vector<4x4xf32>, vector<128x4xf32> -> vector<128x4xf32>
    %58 = arith.addf %52, %57 : vector<128x4xf32>
    %c0_54 = arith.constant 0 : index
    %c2_55 = arith.constant 2 : index
    %c1_56 = arith.constant 1 : index
    %c0_57 = arith.constant 0 : index
    %59 = vector.load %arg12[%c0_54, %c2_55, %c1_56, %c0_57] : memref<2x10x10x4xf32, #tpu.memory_space<vmem>>, vector<2x8x8x4xf32>
    %60 = vector.shape_cast %59 : vector<2x8x8x4xf32> to vector<128x4xf32>
    %61 = vector.extract_strided_slice %15 {offsets = [7, 0, 0], sizes = [1, 4, 4], strides = [1, 1, 1]} : vector<9x4x4xf32> to vector<1x4x4xf32>
    %62 = vector.shape_cast %61 : vector<1x4x4xf32> to vector<4x4xf32>
    %cst_58 = arith.constant dense<0.000000e+00> : vector<128x4xf32>
    %63 = tpu.matmul %60, %62, %cst_58 {dimension_numbers = #tpu.dot_dimension_numbers<[1], [0], [0], [1], [0, 0, 1, 1], [], []>} : vector<128x4xf32>, vector<4x4xf32>, vector<128x4xf32> -> vector<128x4xf32>
    %64 = arith.addf %58, %63 : vector<128x4xf32>
    %c0_59 = arith.constant 0 : index
    %c2_60 = arith.constant 2 : index
    %c2_61 = arith.constant 2 : index
    %c0_62 = arith.constant 0 : index
    %65 = vector.load %arg12[%c0_59, %c2_60, %c2_61, %c0_62] : memref<2x10x10x4xf32, #tpu.memory_space<vmem>>, vector<2x8x8x4xf32>
    %66 = vector.shape_cast %65 : vector<2x8x8x4xf32> to vector<128x4xf32>
    %67 = vector.extract_strided_slice %15 {offsets = [8, 0, 0], sizes = [1, 4, 4], strides = [1, 1, 1]} : vector<9x4x4xf32> to vector<1x4x4xf32>
    %68 = vector.shape_cast %67 : vector<1x4x4xf32> to vector<4x4xf32>
    %cst_63 = arith.constant dense<0.000000e+00> : vector<128x4xf32>
    %69 = tpu.matmul %66, %68, %cst_63 {dimension_numbers = #tpu.dot_dimension_numbers<[1], [0], [0], [1], [0, 0, 1, 1], [], []>} : vector<128x4xf32>, vector<4x4xf32>, vector<128x4xf32> -> vector<128x4xf32>
    %70 = arith.addf %64, %69 : vector<128x4xf32>
    %c0_64 = arith.constant 0 : index
    %c0_65 = arith.constant 0 : index
    %71 = vector.load %arg6[%c0_64, %c0_65] : memref<1x4xf32, #tpu.memory_space<vmem>>, vector<1x4xf32>
    %72 = vector.broadcast %71 : vector<1x4xf32> to vector<128x4xf32>
    %73 = arith.mulf %70, %72 : vector<128x4xf32>
    %c0_66 = arith.constant 0 : index
    %c0_67 = arith.constant 0 : index
    %74 = vector.load %arg7[%c0_66, %c0_67] : memref<1x4xf32, #tpu.memory_space<vmem>>, vector<1x4xf32>
    %75 = vector.broadcast %74 : vector<1x4xf32> to vector<128x4xf32>
    %76 = arith.addf %73, %75 : vector<128x4xf32>
    %cst_68 = arith.constant 0.000000e+00 : f32
    %77 = vector.broadcast %cst_68 : f32 to vector<128x4xf32>
    %78 = arith.maximumf %76, %77 : vector<128x4xf32>
    %c0_69 = arith.constant 0 : index
    %c0_70 = arith.constant 0 : index
    %79 = vector.load %arg8[%c0_69, %c0_70] : memref<4x16xf32, #tpu.memory_space<vmem>>, vector<4x16xf32>
    %cst_71 = arith.constant dense<0.000000e+00> : vector<128x16xf32>
    %80 = tpu.matmul %78, %79, %cst_71 {dimension_numbers = #tpu.dot_dimension_numbers<[1], [0], [0], [1], [0, 0, 1, 1], [], []>} : vector<128x4xf32>, vector<4x16xf32>, vector<128x16xf32> -> vector<128x16xf32>
    %c0_72 = arith.constant 0 : index
    %c0_73 = arith.constant 0 : index
    %81 = vector.load %arg9[%c0_72, %c0_73] : memref<1x16xf32, #tpu.memory_space<vmem>>, vector<1x16xf32>
    %82 = vector.broadcast %81 : vector<1x16xf32> to vector<128x16xf32>
    %83 = arith.mulf %80, %82 : vector<128x16xf32>
    %c0_74 = arith.constant 0 : index
    %c0_75 = arith.constant 0 : index
    %84 = vector.load %arg10[%c0_74, %c0_75] : memref<1x16xf32, #tpu.memory_space<vmem>>, vector<1x16xf32>
    %85 = vector.broadcast %84 : vector<1x16xf32> to vector<128x16xf32>
    %86 = arith.addf %83, %85 : vector<128x16xf32>
    %87 = arith.addf %86, %0 : vector<128x16xf32>
    %cst_76 = arith.constant 0.000000e+00 : f32
    %88 = vector.broadcast %cst_76 : f32 to vector<128x16xf32>
    %89 = arith.maximumf %87, %88 : vector<128x16xf32>
    %c0_77 = arith.constant 0 : index
    %c0_78 = arith.constant 0 : index
    %90 = vector.load %arg11[%c0_77, %c0_78] : memref<128x16xf32, #tpu.memory_space<vmem>>, vector<128x16xf32>
    tpu.vector_store %arg11[%c0_77, %c0_78], %89 {strides = array<i32>} : memref<128x16xf32, #tpu.memory_space<vmem>>, vector<128x16xf32>,
    return
  }
  func.func @transform_0(%arg0: i32) -> (i32, i32) {
    %c0_i32 = arith.constant 0 : i32
    %c0_i32_0 = arith.constant 0 : i32
    %c0_i32_1 = arith.constant 0 : i32
    return %c0_i32, %c0_i32_0 : i32, i32
  }
  func.func @transform_1(%arg0: i32) -> (i32, i32) {
    %c0_i32 = arith.constant 0 : i32
    %c0_i32_0 = arith.constant 0 : i32
    %c0_i32_1 = arith.constant 0 : i32
    return %c0_i32, %c0_i32_0 : i32, i32
  }
  func.func @transform_2(%arg0: i32) -> (i32, i32) {
    %c0_i32 = arith.constant 0 : i32
    %c0_i32_0 = arith.constant 0 : i32
    %c0_i32_1 = arith.constant 0 : i32
    return %c0_i32, %c0_i32_0 : i32, i32
  }
  func.func @transform_3(%arg0: i32) -> (i32, i32) {
    %c0_i32 = arith.constant 0 : i32
    %c0_i32_0 = arith.constant 0 : i32
    %c0_i32_1 = arith.constant 0 : i32
    return %c0_i32, %c0_i32_0 : i32, i32
  }
  func.func @transform_4(%arg0: i32) -> (i32, i32, i32) {
    %c0_i32 = arith.constant 0 : i32
    %c0_i32_0 = arith.constant 0 : i32
    %c0_i32_1 = arith.constant 0 : i32
    %c0_i32_2 = arith.constant 0 : i32
    return %c0_i32, %c0_i32_0, %c0_i32_1 : i32, i32, i32
  }
  func.func @transform_5(%arg0: i32) -> (i32, i32) {
    %c0_i32 = arith.constant 0 : i32
    %c0_i32_0 = arith.constant 0 : i32
    %c0_i32_1 = arith.constant 0 : i32
    return %c0_i32, %c0_i32_0 : i32, i32
  }
  func.func @transform_6(%arg0: i32) -> (i32, i32) {
    %c0_i32 = arith.constant 0 : i32
    %c0_i32_0 = arith.constant 0 : i32
    %c0_i32_1 = arith.constant 0 : i32
    return %c0_i32, %c0_i32_0 : i32, i32
  }
  func.func @transform_7(%arg0: i32) -> (i32, i32) {
    %c0_i32 = arith.constant 0 : i32
    %c0_i32_0 = arith.constant 0 : i32
    %c0_i32_1 = arith.constant 0 : i32
    return %c0_i32, %c0_i32_0 : i32, i32
  }
  func.func @transform_8(%arg0: i32) -> (i32, i32) {
    %c0_i32 = arith.constant 0 : i32
    %c0_i32_0 = arith.constant 0 : i32
    %c0_i32_1 = arith.constant 0 : i32
    return %c0_i32, %c0_i32_0 : i32, i32
  }
  func.func @transform_9(%arg0: i32) -> (i32, i32) {
    %c0_i32 = arith.constant 0 : i32
    %c0_i32_0 = arith.constant 0 : i32
    %c0_i32_1 = arith.constant 0 : i32
    return %c0_i32, %c0_i32_0 : i32, i32
  }
  func.func @transform_10(%arg0: i32) -> (i32, i32) {
    %c0_i32 = arith.constant 0 : i32
    %c0_i32_0 = arith.constant 0 : i32
    %c0_i32_1 = arith.constant 0 : i32
    return %c0_i32, %c0_i32_0 : i32, i32
  }
}

</mosaic_0001>

<bundles_post_ra>
// kernel: tpu_custom_call.1
= control target key start
LH: loop header
LB: loop body
LE: loop exit
PB: predicated region body
PF: predicated region fallthrough
CT: control target
= control target key end

     0   :  { %vm53_vm0 = vcmask 130048   ;;  %vm223_vm1 = vcmask 31744   ;;  %vm225_vm2 = vcmask 25600   ;;  %v2070_v14 = vmov 0.0   ;;  %s3064_s1 = inlined_call_operand.vmem [shape: f32[16,4], index: 1, kind: input, shape index: {}]   ;;  %s3065_s0 = inlined_call_operand.vmem [shape: f32[128,16], index: 0, kind: input, shape index: {}]   ;;  %s3066_s2 = inlined_call_operand.vmem [shape: f32[1,4], index: 2, kind: input, shape index: {}]   ;;  %s3067_s3 = inlined_call_operand.vmem [shape: f32[1,4], index: 3, kind: input, shape index: {}]   ;;  %s3068_s4 = inlined_call_operand.vmem [shape: f32[9,4,4], index: 4, kind: input, shape index: {}]   ;;  %s3069_s7 = inlined_call_operand.vmem [shape: f32[4,16], index: 7, kind: input, shape index: {}]   ;;  %s3070_s5 = inlined_call_operand.vmem [shape: f32[1,4], index: 5, kind: input, shape index: {}]   ;;  %s3071_s6 = inlined_call_operand.vmem [shape: f32[1,4], index: 6, kind: input, shape index: {}]   ;;  %s3072_s8 = inlined_call_operand.vmem [shape: f32[1,16], index: 8, kind: input, shape index: {}]   ;;  %s3073_s9 = inlined_call_operand.vmem [shape: f32[1,16], index: 9, kind: input, shape index: {}]   ;;  %s3074_s10 = inlined_call_operand.vmem [shape: f32[128,16], index: 10, kind: output, shape index: {}]  }
   0x1   :  { %v52_v0 = vld [vmem:[%s3064_s1 + $0x8] sm:$0xff]  ;;  %v51_v1 = vld [vmem:[%s3064_s1] sm:$0xff]  ;;  %v37_v4 = vld [vmem:[%s3065_s0 + $0x10] sm:$0xff]  ;;  %227 = vst.msk [vmem:[#allocation2 + $0x10] sm:$0xff] %vm223_vm1, %v2070_v14  ;;  %vm371_vm3 = vcmask 1043456  }
   0x2   :  { %116 = vmatpush.msra.mxu0 %v52_v0  ;;  %v35_v2 = vld [vmem:[%s3065_s0] sm:$0xff]  ;;  %v36_v3 = vld [vmem:[%s3065_s0 + $0x8] sm:$0xff]  ;;  %v38_v5 = vld [vmem:[%s3065_s0 + $0x18] sm:$0xff]  ;;  %228 = vst.msk [vmem:[#allocation2 + $0x18] sm:$0x3] %vm225_vm2, %v2070_v14 }
   0x3   :  { %v39_v6 = vld [vmem:[%s3065_s0 + $0x20] sm:$0xff]  ;;  %v40_v7 = vld [vmem:[%s3065_s0 + $0x28] sm:$0xff]  ;;  %v41_v8 = vld [vmem:[%s3065_s0 + $0x30] sm:$0xff]  ;;  %224 = vst.msk [vmem:[#allocation2] sm:$0xff] %vm223_vm1, %v2070_v14 }
   0x4   :  { %117 = vmatpush.msra.mxu0 %v51_v1  ;;  %v42_v9 = vld [vmem:[%s3065_s0 + $0x38] sm:$0xff]  ;;  %v43_v10 = vld [vmem:[%s3065_s0 + $0x40] sm:$0xff]  ;;  %v44_v11 = vld [vmem:[%s3065_s0 + $0x48] sm:$0xff]  ;;  %226 = vst.msk [vmem:[#allocation2 + $0x8] sm:$0x3] %vm225_vm2, %v2070_v14 }
   0x5   :  { %1858 = vmatmul.msk.f32.vlgmr.msra.gmra.mxu0 %vm53_vm0, %v35_v2  ;;  %v45_v12 = vld [vmem:[%s3065_s0 + $0x50] sm:$0xff]  ;;  %v46_v13 = vld [vmem:[%s3065_s0 + $0x58] sm:$0xff]  ;;  %v47_v15 = vld [vmem:[%s3065_s0 + $0x60] sm:$0xff]  ;;  %229 = vst.msk [vmem:[#allocation2 + $0x20] sm:$0xff] %vm223_vm1, %v2070_v14 }
   0x6   :  { %230 = vst.msk [vmem:[#allocation2 + $0x28] sm:$0x3] %vm225_vm2, %v2070_v14  ;;  %v283_v16 = vld [vmem:[%s3068_s4 + $0x4] sm:$0xf]  ;;  %v48_v17 = vld [vmem:[%s3065_s0 + $0x68] sm:$0xff]  ;;  %v49_v18 = vld [vmem:[%s3065_s0 + $0x70] sm:$0xff] }
   0x7   :  { %231 = vst.msk [vmem:[#allocation2 + $0x30] sm:$0xff] %vm223_vm1, %v2070_v14  ;;  %1874 = vmatpush.msk.msrb.mxu0 %vm371_vm3, %v283_v16  ;;  %2044 = vmatpush.msk.msra.mxu1 %vm371_vm3, %v283_v16  ;;  %v50_v19 = vld [vmem:[%s3065_s0 + $0x78] sm:$0xff]  ;;  %v2264_v20 = vld [vmem:[%s3066_s2] ss:$0 sm:$0xff]  ;;  %v284_v28 = vld [vmem:[%s3068_s4 + $0x8] sm:$0xf] }
   0x8   :  { %232 = vst.msk [vmem:[#allocation2 + $0x38] sm:$0x3] %vm225_vm2, %v2070_v14  ;;  %v2273_v21 = vld [vmem:[%s3067_s3] ss:$0 sm:$0xff]  ;;  %2046 = vmatpush.msk.msra.mxu3 %vm371_vm3, %v284_v28  ;;  %v286_v30 = vld [vmem:[%s3068_s4 + $0x10] sm:$0xf] }
   0x9   :  { %233 = vst.msk [vmem:[#allocation2 + $0x40] sm:$0xff] %vm223_vm1, %v2070_v14  ;;  %v282_v27 = vld [vmem:[%s3068_s4] sm:$0xf]  ;;  %v285_v35 = vld [vmem:[%s3068_s4 + $0xc] sm:$0xf] }
   0xa   :  { %234 = vst.msk [vmem:[#allocation2 + $0x48] sm:$0x3] %vm225_vm2, %v2070_v14  ;;  %1891 = vmatpush.msk.msra.mxu0 %vm371_vm3, %v282_v27  ;;  %2045 = vmatpush.msk.msra.mxu2 %vm371_vm3, %v282_v27  ;;  %v291_v49 = vld [vmem:[#allocation2] sm:$0xff] }
   0xb   :  { %235 = vst.msk [vmem:[#allocation2 + $0x50] sm:$0xff] %vm223_vm1, %v2070_v14  ;;  %v307_v23 = vld [vmem:[#allocation2 + $0x1] sm:$0xff]  ;;  %1925 = vmatpush.msk.msrb.mxu1 %vm371_vm3, %v285_v35 }
   0xc   :  { %236 = vst.msk [vmem:[#allocation2 + $0x58] sm:$0x3] %vm225_vm2, %v2070_v14  ;;  %1942 = vmatpush.msk.msrb.mxu2 %vm371_vm3, %v286_v30 }
   0xd   :  { %1859 = vmatmul.msk.f32.gmra.mxu0 %vm53_vm0, %v36_v3  ;;  %237 = vst.msk [vmem:[#allocation2 + $0x60] sm:$0xff] %vm223_vm1, %v2070_v14 }
   0xe   :  { %238 = vst.msk [vmem:[#allocation2 + $0x68] sm:$0x3] %vm225_vm2, %v2070_v14 }
   0xf   :  { %239 = vst.msk [vmem:[#allocation2 + $0x70] sm:$0xff] %vm223_vm1, %v2070_v14 }
  0x10   :  { %240 = vst.msk [vmem:[#allocation2 + $0x78] sm:$0x3] %vm225_vm2, %v2070_v14 }
  0x11   :  { %241 = vst.msk [vmem:[#allocation2 + $0x80] sm:$0xff] %vm223_vm1, %v2070_v14 }
  0x12   :  { %242 = vst.msk [vmem:[#allocation2 + $0x88] sm:$0x3] %vm225_vm2, %v2070_v14 }
  0x13   :  { %243 = vst.msk [vmem:[#allocation2 + $0x90] sm:$0xff] %vm223_vm1, %v2070_v14 }
  0x14   :  { %244 = vst.msk [vmem:[#allocation2 + $0x98] sm:$0x3] %vm225_vm2, %v2070_v14 }
  0x15   :  { %1860 = vmatmul.msk.f32.gmra.mxu0 %vm53_vm0, %v37_v4  ;;  %245 = vst.msk [vmem:[#allocation2 + $0xa0] sm:$0xff] %vm223_vm1, %v2070_v14 }
  0x16   :  { %246 = vst.msk [vmem:[#allocation2 + $0xa8] sm:$0x3] %vm225_vm2, %v2070_v14 }
  0x17   :  { %247 = vst.msk [vmem:[#allocation2 + $0xb0] sm:$0xff] %vm223_vm1, %v2070_v14 }
  0x18   :  { %248 = vst.msk [vmem:[#allocation2 + $0xb8] sm:$0x3] %vm225_vm2, %v2070_v14 }
  0x19   :  { %249 = vst.msk [vmem:[#allocation2 + $0xc0] sm:$0xff] %vm223_vm1, %v2070_v14 }
  0x1a   :  { %250 = vst.msk [vmem:[#allocation2 + $0xc8] sm:$0x3] %vm225_vm2, %v2070_v14 }
  0x1b   :  { %251 = vst.msk [vmem:[#allocation2 + $0xd0] sm:$0xff] %vm223_vm1, %v2070_v14 }
  0x1c   :  { %252 = vst.msk [vmem:[#allocation2 + $0xd8] sm:$0x3] %vm225_vm2, %v2070_v14 }
  0x1d   :  { %1861 = vmatmul.msk.f32.gmra.mxu0 %vm53_vm0, %v38_v5  ;;  %253 = vst.msk [vmem:[#allocation2 + $0xe0] sm:$0xff] %vm223_vm1, %v2070_v14 }
  0x1e   :  { %254 = vst.msk [vmem:[#allocation2 + $0xe8] sm:$0x3] %vm225_vm2, %v2070_v14 }
  0x1f   :  { %255 = vst.msk [vmem:[#allocation2 + $0xf0] sm:$0xff] %vm223_vm1, %v2070_v14 }
  0x20   :  { %256 = vst.msk [vmem:[#allocation2 + $0xf8] sm:$0x3] %vm225_vm2, %v2070_v14 }
  0x21   :  { %257 = vst.msk [vmem:[#allocation2 + $0x100] sm:$0xff] %vm223_vm1, %v2070_v14 }
  0x22   :  { %258 = vst.msk [vmem:[#allocation2 + $0x108] sm:$0x3] %vm225_vm2, %v2070_v14 }
  0x23   :  { %259 = vst.msk [vmem:[#allocation2 + $0x110] sm:$0xff] %vm223_vm1, %v2070_v14 }
  0x24   :  { %260 = vst.msk [vmem:[#allocation2 + $0x118] sm:$0x3] %vm225_vm2, %v2070_v14 }
  0x25   :  { %1862 = vmatmul.msk.f32.gmra.mxu0 %vm53_vm0, %v39_v6  ;;  %261 = vst.msk [vmem:[#allocation2 + $0x120] sm:$0xff] %vm223_vm1, %v2070_v14 }
  0x26   :  { %262 = vst.msk [vmem:[#allocation2 + $0x128] sm:$0x3] %vm225_vm2, %v2070_v14 }
  0x27   :  { %263 = vst.msk [vmem:[#allocation2 + $0x130] sm:$0xff] %vm223_vm1, %v2070_v14 }
  0x28   :  { %264 = vst.msk [vmem:[#allocation2 + $0x138] sm:$0x3] %vm225_vm2, %v2070_v14 }
  0x2d   :  { %1863 = vmatmul.msk.f32.gmra.mxu0 %vm53_vm0, %v40_v7 }
  0x35   :  { %1864 = vmatmul.msk.f32.gmra.mxu0 %vm53_vm0, %v41_v8 }
  0x3d   :  { %1865 = vmatmul.msk.f32.gmra.mxu0 %vm53_vm0, %v42_v9 }
  0x45   :  { %1866 = vmatmul.msk.f32.gmra.mxu0 %vm53_vm0, %v43_v10 }
  0x4d   :  { %1867 = vmatmul.msk.f32.gmra.mxu0 %vm53_vm0, %v44_v11 }
  0x55   :  { %1868 = vmatmul.msk.f32.gmra.mxu0 %vm53_vm0, %v45_v12 }
  0x5d   :  { %1869 = vmatmul.msk.f32.gmra.mxu0 %vm53_vm0, %v46_v13 }
  0x65   :  { %1870 = vmatmul.msk.f32.gmra.mxu0 %vm53_vm0, %v47_v15 }
  0x6d   :  { %1871 = vmatmul.msk.f32.gmra.mxu0 %vm53_vm0, %v48_v17  ;;  %v315_v17 = vld [vmem:[#allocation2 + $0xa1] sm:$0xff] }
  0x75   :  { %1872 = vmatmul.msk.f32.gmra.mxu0 %vm53_vm0, %v49_v18  ;;  %v556_v18 = vld [vmem:[#allocation2 + $0x2] sm:$0xff] }
  0x7d   :  { %1873 = vmatmul.msk.f32.gmra.mxu0 %vm53_vm0, %v50_v19 }
  0x82   :  { %v119_v22 = vpop.f32.mrf.mxu0 }
  0x83   :  { %v171_v24 = vmul.f32 %v2264_v20, %v119_v22  ;;  %v299_v22 = vld [vmem:[#allocation2 + $0xa0] sm:$0xff] }
  0x85   :  { %v191_v25 = vadd.f32 %v2273_v21, %v171_v24  ;;  %1875 = vmatmul.msk.f32.vlgmr.msrb.gmra.mxu0 %vm223_vm1, %v307_v23  ;;  %v564_v23 = vld [vmem:[#allocation2 + $0xa2] sm:$0xff]  ;;  %v288_v24 = vld [vmem:[%s3068_s4 + $0x18] sm:$0xf] }
  0x86   :  { %1908 = vmatpush.msk.msrb.mxu0 %vm371_vm3, %v284_v28 }
  0x87   :  { %v207_v26 = vmax.f32 %v191_v25, 0.0 }
  0x89   :  { %266 = vst.msk [vmem:[#allocation2 + $0x11] sm:$0xff] %vm223_vm1, %v207_v26 }
  0x8a   :  { %v122_v29 = vpop.f32.mrf.mxu0 }
  0x8b   :  { %v172_v31 = vmul.f32 %v2264_v20, %v122_v29 }
  0x8d   :  { %v192_v32 = vadd.f32 %v2273_v21, %v172_v31 }
  0x8f   :  { %v208_v33 = vmax.f32 %v192_v32, 0.0 }
  0x90   :  { %v2311_v34 = vld [vmem:[#allocation2 + $0x11] sm:$0xff] }
  0x91   :  { %267 = vst.msk [vmem:[#allocation2 + $0x21] sm:$0xff] %vm223_vm1, %v208_v33  ;;  %1876 = vmatmul.msk.f32.gmra.mxu0 %vm223_vm1, %v2311_v34  ;;  %v2352_v58 = vld [vmem:[#allocation2 + $0x10] sm:$0xff] }
  0x92   :  { %v125_v36 = vpop.f32.mrf.mxu0  ;;  %v2420_v29 = vld [vmem:[#allocation2 + $0x12] sm:$0xff] }
  0x93   :  { %v173_v37 = vmul.f32 %v2264_v20, %v125_v36 }
  0x95   :  { %v193_v38 = vadd.f32 %v2273_v21, %v173_v37 }
  0x97   :  { %v209_v39 = vmax.f32 %v193_v38, 0.0 }
  0x98   :  { %v2322_v40 = vld [vmem:[#allocation2 + $0x21] sm:$0xff] }
  0x99   :  { %268 = vst.msk [vmem:[#allocation2 + $0x31] sm:$0xff] %vm223_vm1, %v209_v39  ;;  %1877 = vmatmul.msk.f32.gmra.mxu0 %vm223_vm1, %v2322_v40  ;;  %v2371_v2 = vld [vmem:[#allocation2 + $0x20] sm:$0xff] }
  0x9a   :  { %v128_v41 = vpop.f32.mrf.mxu0  ;;  %v2439_v38 = vld [vmem:[#allocation2 + $0x22] sm:$0xff] }
  0x9b   :  { %v174_v42 = vmul.f32 %v2264_v20, %v128_v41 }
  0x9d   :  { %v194_v43 = vadd.f32 %v2273_v21, %v174_v42 }
  0x9f   :  { %v210_v44 = vmax.f32 %v194_v43, 0.0 }
  0xa0   :  { %v2329_v45 = vld [vmem:[#allocation2 + $0x31] sm:$0xff] }
  0xa1   :  { %269 = vst.msk [vmem:[#allocation2 + $0x41] sm:$0xff] %vm223_vm1, %v210_v44  ;;  %1878 = vmatmul.msk.f32.gmra.mxu0 %vm223_vm1, %v2329_v45  ;;  %v2390_v10 = vld [vmem:[#allocation2 + $0x30] sm:$0xff] }
  0xa2   :  { %v131_v46 = vpop.f32.mrf.mxu0 }
  0xa3   :  { %v175_v47 = vmul.f32 %v2264_v20, %v131_v46 }
  0xa5   :  { %v195_v48 = vadd.f32 %v2273_v21, %v175_v47 }
  0xa7   :  { %v211_v50 = vmax.f32 %v195_v48, 0.0  ;;  %v2458_v48 = vld [vmem:[#allocation2 + $0x32] sm:$0xff] }
  0xa8   :  { %v2336_v51 = vld [vmem:[#allocation2 + $0x41] sm:$0xff] }
  0xa9   :  { %v2338_v52 = vld [vmem:[#allocation2 + $0x40] sm:$0xff]  ;;  %270 = vst.msk [vmem:[#allocation2 + $0x51] sm:$0xff] %vm223_vm1, %v211_v50  ;;  %1879 = vmatmul.msk.f32.vlgmr.msra.gmra.mxu1 %vm223_vm1, %v2336_v51  ;;  %1892 = vmatmul.msk.f32.vlgmr.msra.gmra.mxu0 %vm223_vm1, %v291_v49 }
  0xaa   :  { %v2340_v53 = vld [vmem:[#allocation2 + $0x42] sm:$0xff]  ;;  %1896 = vmatmul.msk.f32.vlgmr.msra.gmra.mxu2 %vm223_vm1, %v2338_v52  ;;  %v134_v54 = vpop.f32.mrf.mxu0  ;;  %1976 = vmatpush.msk.msra.mxu0 %vm371_vm3, %v288_v24 }
  0xab   :  { %1913 = vmatmul.msk.f32.vlgmr.msra.gmra.mxu3 %vm223_vm1, %v2340_v53  ;;  %v176_v55 = vmul.f32 %v2264_v20, %v134_v54 }
  0xad   :  { %v196_v56 = vadd.f32 %v2273_v21, %v176_v55 }
  0xaf   :  { %v212_v57 = vmax.f32 %v196_v56, 0.0  ;;  %v287_v56 = vld [vmem:[%s3068_s4 + $0x14] sm:$0xf] }
  0xb0   :  { %v2354_v59 = vld [vmem:[#allocation2 + $0x51] sm:$0xff]  ;;  %1959 = vmatpush.msk.msrb.mxu3 %vm371_vm3, %v287_v56 }
  0xb1   :  { %v2356_v60 = vld [vmem:[#allocation2 + $0x50] sm:$0xff]  ;;  %271 = vst.msk [vmem:[#allocation2 + $0x61] sm:$0xff] %vm223_vm1, %v212_v57  ;;  %1880 = vmatmul.msk.f32.gmra.mxu1 %vm223_vm1, %v2354_v59  ;;  %1893 = vmatmul.msk.f32.gmra.mxu0 %vm223_vm1, %v2352_v58 }
  0xb2   :  { %v2358_v61 = vld [vmem:[#allocation2 + $0x52] sm:$0xff]  ;;  %1897 = vmatmul.msk.f32.gmra.mxu2 %vm223_vm1, %v2356_v60  ;;  %v137_v62 = vpop.f32.mrf.mxu0 }
  0xb3   :  { %1914 = vmatmul.msk.f32.gmra.mxu3 %vm223_vm1, %v2358_v61  ;;  %v177_v63 = vmul.f32 %v2264_v20, %v137_v62 }
  0xb5   :  { %v197_v0 = vadd.f32 %v2273_v21, %v177_v63 }
  0xb7   :  { %v213_v1 = vmax.f32 %v197_v0, 0.0 }
  0xb8   :  { %v2373_v3 = vld [vmem:[#allocation2 + $0x61] sm:$0xff] }
  0xb9   :  { %v2375_v4 = vld [vmem:[#allocation2 + $0x60] sm:$0xff]  ;;  %272 = vst.msk [vmem:[#allocation2 + $0x71] sm:$0xff] %vm223_vm1, %v213_v1  ;;  %1881 = vmatmul.msk.f32.gmra.mxu1 %vm223_vm1, %v2373_v3  ;;  %1894 = vmatmul.msk.f32.gmra.mxu0 %vm223_vm1, %v2371_v2 }
  0xba   :  { %v2377_v5 = vld [vmem:[#allocation2 + $0x62] sm:$0xff]  ;;  %1898 = vmatmul.msk.f32.gmra.mxu2 %vm223_vm1, %v2375_v4  ;;  %v140_v6 = vpop.f32.mrf.mxu0 }
  0xbb   :  { %1915 = vmatmul.msk.f32.gmra.mxu3 %vm223_vm1, %v2377_v5  ;;  %v178_v7 = vmul.f32 %v2264_v20, %v140_v6 }
  0xbd   :  { %v198_v8 = vadd.f32 %v2273_v21, %v178_v7 }
  0xbf   :  { %v214_v9 = vmax.f32 %v198_v8, 0.0  ;;  %v290_v8 = vld [vmem:[%s3068_s4 + $0x20] sm:$0xf] }
  0xc0   :  { %v2392_v11 = vld [vmem:[#allocation2 + $0x71] sm:$0xff]  ;;  %2010 = vmatpush.msk.msra.mxu2 %vm371_vm3, %v290_v8 }
  0xc1   :  { %v2394_v12 = vld [vmem:[#allocation2 + $0x70] sm:$0xff]  ;;  %273 = vst.msk [vmem:[#allocation2 + $0x81] sm:$0xff] %vm223_vm1, %v214_v9  ;;  %1882 = vmatmul.msk.f32.gmra.mxu1 %vm223_vm1, %v2392_v11  ;;  %1895 = vmatmul.msk.f32.gmra.mxu0 %vm223_vm1, %v2390_v10  ;;  %v289_v9 = vld [vmem:[%s3068_s4 + $0x1c] sm:$0xf] }
  0xc2   :  { %v2396_v13 = vld [vmem:[#allocation2 + $0x72] sm:$0xff]  ;;  %1899 = vmatmul.msk.f32.gmra.mxu2 %vm223_vm1, %v2394_v12  ;;  %v143_v14 = vpop.f32.mrf.mxu0  ;;  %1993 = vmatpush.msk.msra.mxu1 %vm371_vm3, %v289_v9 }
  0xc3   :  { %1916 = vmatmul.msk.f32.gmra.mxu3 %vm223_vm1, %v2396_v13  ;;  %v179_v15 = vmul.f32 %v2264_v20, %v143_v14 }
  0xc5   :  { %v199_v16 = vadd.f32 %v2273_v21, %v179_v15 }
  0xc7   :  { %v215_v19 = vmax.f32 %v199_v16, 0.0 }
  0xc9   :  { %274 = vst.msk [vmem:[#allocation2 + $0xb1] sm:$0xff] %vm223_vm1, %v215_v19  ;;  %1883 = vmatmul.msk.f32.gmra.mxu1 %vm223_vm1, %v315_v17  ;;  %1909 = vmatmul.msk.f32.vlgmr.msrb.gmra.mxu0 %vm223_vm1, %v556_v18 }
  0xca   :  { %1900 = vmatmul.msk.f32.gmra.mxu2 %vm223_vm1, %v299_v22  ;;  %v146_v25 = vpop.f32.mrf.mxu0 }
  0xcb   :  { %1917 = vmatmul.msk.f32.gmra.mxu3 %vm223_vm1, %v564_v23  ;;  %v180_v26 = vmul.f32 %v2264_v20, %v146_v25 }
  0xcd   :  { %v200_v27 = vadd.f32 %v2273_v21, %v180_v26 }
  0xcf   :  { %v216_v28 = vmax.f32 %v200_v27, 0.0 }
  0xd0   :  { %v2422_v30 = vld [vmem:[#allocation2 + $0xb1] sm:$0xff] }
  0xd1   :  { %v2424_v31 = vld [vmem:[#allocation2 + $0xb0] sm:$0xff]  ;;  %275 = vst.msk [vmem:[#allocation2 + $0xc1] sm:$0xff] %vm223_vm1, %v216_v28  ;;  %1884 = vmatmul.msk.f32.gmra.mxu1 %vm223_vm1, %v2422_v30  ;;  %1910 = vmatmul.msk.f32.gmra.mxu0 %vm223_vm1, %v2420_v29 }
  0xd2   :  { %v2426_v32 = vld [vmem:[#allocation2 + $0xb2] sm:$0xff]  ;;  %1901 = vmatmul.msk.f32.gmra.mxu2 %vm223_vm1, %v2424_v31  ;;  %v149_v33 = vpop.f32.mrf.mxu0 }
  0xd3   :  { %1918 = vmatmul.msk.f32.gmra.mxu3 %vm223_vm1, %v2426_v32  ;;  %v181_v35 = vmul.f32 %v2264_v20, %v149_v33 }
  0xd5   :  { %v201_v36 = vadd.f32 %v2273_v21, %v181_v35 }
  0xd7   :  { %v217_v37 = vmax.f32 %v201_v36, 0.0 }
  0xd8   :  { %v2441_v39 = vld [vmem:[#allocation2 + $0xc1] sm:$0xff] }
  0xd9   :  { %v2443_v41 = vld [vmem:[#allocation2 + $0xc0] sm:$0xff]  ;;  %276 = vst.msk [vmem:[#allocation2 + $0xd1] sm:$0xff] %vm223_vm1, %v217_v37  ;;  %1885 = vmatmul.msk.f32.gmra.mxu1 %vm223_vm1, %v2441_v39  ;;  %1911 = vmatmul.msk.f32.gmra.mxu0 %vm223_vm1, %v2439_v38 }
  0xda   :  { %v2445_v42 = vld [vmem:[#allocation2 + $0xc2] sm:$0xff]  ;;  %1902 = vmatmul.msk.f32.gmra.mxu2 %vm223_vm1, %v2443_v41  ;;  %v152_v43 = vpop.f32.mrf.mxu0 }
  0xdb   :  { %1919 = vmatmul.msk.f32.gmra.mxu3 %vm223_vm1, %v2445_v42  ;;  %v182_v44 = vmul.f32 %v2264_v20, %v152_v43 }
  0xdd   :  { %v202_v46 = vadd.f32 %v2273_v21, %v182_v44 }
  0xdf   :  { %v218_v47 = vmax.f32 %v202_v46, 0.0 }
  0xe0   :  { %v2460_v49 = vld [vmem:[#allocation2 + $0xd1] sm:$0xff] }
  0xe1   :  { %v2462_v50 = vld [vmem:[#allocation2 + $0xd0] sm:$0xff]  ;;  %277 = vst.msk [vmem:[#allocation2 + $0xe1] sm:$0xff] %vm223_vm1, %v218_v47  ;;  %1886 = vmatmul.msk.f32.gmra.mxu1 %vm223_vm1, %v2460_v49  ;;  %1912 = vmatmul.msk.f32.gmra.mxu0 %vm223_vm1, %v2458_v48 }
  0xe2   :  { %v2464_v54 = vld [vmem:[#allocation2 + $0xd2] sm:$0xff]  ;;  %1903 = vmatmul.msk.f32.gmra.mxu2 %vm223_vm1, %v2462_v50  ;;  %v155_v55 = vpop.f32.mrf.mxu0 }
  0xe3   :  { %1920 = vmatmul.msk.f32.gmra.mxu3 %vm223_vm1, %v2464_v54  ;;  %v183_v57 = vmul.f32 %v2264_v20, %v155_v55 }
  0xe5   :  { %v203_v62 = vadd.f32 %v2273_v21, %v183_v57 }
  0xe7   :  { %v219_v63 = vmax.f32 %v203_v62, 0.0 }
  0xe8   :  { %v2481_v0 = vld [vmem:[#allocation2 + $0xe1] sm:$0xff] }
  0xe9   :  { %v2483_v1 = vld [vmem:[#allocation2 + $0xe0] sm:$0xff]  ;;  %278 = vst.msk [vmem:[#allocation2 + $0xf1] sm:$0xff] %vm223_vm1, %v219_v63  ;;  %1887 = vmatmul.msk.f32.gmra.mxu1 %vm223_vm1, %v2481_v0  ;;  %1977 = vmatmul.msk.f32.vlgmr.msra.gmra.mxu0 %vm223_vm1, %v2371_v2 }
  0xea   :  { %v2485_v6 = vld [vmem:[#allocation2 + $0xe2] sm:$0xff]  ;;  %1904 = vmatmul.msk.f32.gmra.mxu2 %vm223_vm1, %v2483_v1  ;;  %v158_v7 = vpop.f32.mrf.mxu0 }
  0xeb   :  { %1921 = vmatmul.msk.f32.gmra.mxu3 %vm223_vm1, %v2485_v6  ;;  %v184_v14 = vmul.f32 %v2264_v20, %v158_v7 }
  0xed   :  { %v204_v15 = vadd.f32 %v2273_v21, %v184_v14 }
  0xef   :  { %v220_v16 = vmax.f32 %v204_v15, 0.0  ;;  %v2622_v15 = vld [vmem:[#allocation2 + $0x82] sm:$0xff] }
  0xf0   :  { %v2506_v17 = vld [vmem:[#allocation2 + $0xf1] sm:$0xff] }
  0xf1   :  { %v2508_v18 = vld [vmem:[#allocation2 + $0xf0] sm:$0xff]  ;;  %279 = vst.msk [vmem:[#allocation2 + $0x101] sm:$0xff] %vm223_vm1, %v220_v16  ;;  %1888 = vmatmul.msk.f32.gmra.mxu1 %vm223_vm1, %v2506_v17  ;;  %1978 = vmatmul.msk.f32.gmra.mxu0 %vm223_vm1, %v2390_v10 }
  0xf2   :  { %v2510_v19 = vld [vmem:[#allocation2 + $0xf2] sm:$0xff]  ;;  %1905 = vmatmul.msk.f32.gmra.mxu2 %vm223_vm1, %v2508_v18  ;;  %v161_v22 = vpop.f32.mrf.mxu0 }
  0xf3   :  { %1922 = vmatmul.msk.f32.gmra.mxu3 %vm223_vm1, %v2510_v19  ;;  %v185_v23 = vmul.f32 %v2264_v20, %v161_v22 }
  0xf5   :  { %v205_v24 = vadd.f32 %v2273_v21, %v185_v23 }
  0xf7   :  { %v221_v25 = vmax.f32 %v205_v24, 0.0 }
  0xf8   :  { %v2523_v26 = vld [vmem:[#allocation2 + $0x101] sm:$0xff] }
  0xf9   :  { %v2525_v27 = vld [vmem:[#allocation2 + $0x100] sm:$0xff]  ;;  %280 = vst.msk [vmem:[#allocation2 + $0x111] sm:$0xff] %vm223_vm1, %v221_v25  ;;  %1889 = vmatmul.msk.f32.gmra.mxu1 %vm223_vm1, %v2523_v26  ;;  %1979 = vmatmul.msk.f32.gmra.mxu0 %vm223_vm1, %v2338_v52 }
  0xfa   :  { %v2527_v28 = vld [vmem:[#allocation2 + $0x102] sm:$0xff]  ;;  %1906 = vmatmul.msk.f32.gmra.mxu2 %vm223_vm1, %v2525_v27  ;;  %v164_v33 = vpop.f32.mrf.mxu0 }
  0xfb   :  { %1923 = vmatmul.msk.f32.gmra.mxu3 %vm223_vm1, %v2527_v28  ;;  %v186_v35 = vmul.f32 %v2264_v20, %v164_v33  ;;  %v1155_v20 = vld [vmem:[#allocation2 + $0x80] sm:$0xff] }
  0xfd   :  { %v206_v36 = vadd.f32 %v2273_v21, %v186_v35  ;;  %v1156_v21 = vld [vmem:[#allocation2 + $0x90] sm:$0xff] }
  0xff   :  { %v222_v37 = vmax.f32 %v206_v36, 0.0 }
 0x100   :  { %v2540_v43 = vld [vmem:[#allocation2 + $0x111] sm:$0xff] }
 0x101   :  { %v2542_v44 = vld [vmem:[#allocation2 + $0x110] sm:$0xff]  ;;  %281 = vst.msk [vmem:[#allocation2 + $0x121] sm:$0xff] %vm223_vm1, %v222_v37  ;;  %1890 = vmatmul.msk.f32.gmra.mxu1 %vm223_vm1, %v2540_v43  ;;  %1980 = vmatmul.msk.f32.gmra.mxu0 %vm223_vm1, %v2356_v60 }
 0x102   :  { %v2544_v46 = vld [vmem:[#allocation2 + $0x112] sm:$0xff]  ;;  %1907 = vmatmul.msk.f32.gmra.mxu2 %vm223_vm1, %v2542_v44 }
 0x103   :  { %1924 = vmatmul.msk.f32.gmra.mxu3 %vm223_vm1, %v2544_v46 }
 0x109   :  { %1926 = vmatmul.msk.f32.vlgmr.msrb.gmra.mxu1 %vm223_vm1, %v2352_v58  ;;  %1981 = vmatmul.msk.f32.gmra.mxu0 %vm223_vm1, %v2375_v4 }
 0x10a   :  { %1943 = vmatmul.msk.f32.vlgmr.msrb.gmra.mxu2 %vm223_vm1, %v2311_v34 }
 0x10b   :  { %1960 = vmatmul.msk.f32.vlgmr.msrb.gmra.mxu3 %vm223_vm1, %v2420_v29 }
 0x111   :  { %1927 = vmatmul.msk.f32.gmra.mxu1 %vm223_vm1, %v2371_v2  ;;  %1982 = vmatmul.msk.f32.gmra.mxu0 %vm223_vm1, %v2394_v12 }
 0x112   :  { %1944 = vmatmul.msk.f32.gmra.mxu2 %vm223_vm1, %v2322_v40 }
 0x113   :  { %1961 = vmatmul.msk.f32.gmra.mxu3 %vm223_vm1, %v2439_v38 }
 0x119   :  { %1928 = vmatmul.msk.f32.gmra.mxu1 %vm223_vm1, %v2390_v10  ;;  %1983 = vmatmul.msk.f32.gmra.mxu0 %vm223_vm1, %v1155_v20 }
 0x11a   :  { %1945 = vmatmul.msk.f32.gmra.mxu2 %vm223_vm1, %v2329_v45 }
 0x11b   :  { %1962 = vmatmul.msk.f32.gmra.mxu3 %vm223_vm1, %v2458_v48 }
 0x121   :  { %1929 = vmatmul.msk.f32.gmra.mxu1 %vm223_vm1, %v2338_v52  ;;  %1984 = vmatmul.msk.f32.gmra.mxu0 %vm223_vm1, %v1156_v21 }
 0x122   :  { %1946 = vmatmul.msk.f32.gmra.mxu2 %vm223_vm1, %v2336_v51 }
 0x123   :  { %1963 = vmatmul.msk.f32.gmra.mxu3 %vm223_vm1, %v2340_v53 }
 0x126   :  { %v404_v34 = vpop.f32.mrf.mxu1 }
 0x129   :  { %1930 = vmatmul.msk.f32.gmra.mxu1 %vm223_vm1, %v2356_v60  ;;  %1985 = vmatmul.msk.f32.gmra.mxu0 %vm223_vm1, %v2443_v41  ;;  %v2603_v60 = vpop.f32.mrf.mxu0 }
 0x12a   :  { %1947 = vmatmul.msk.f32.gmra.mxu2 %vm223_vm1, %v2354_v59 }
 0x12b   :  { %1964 = vmatmul.msk.f32.gmra.mxu3 %vm223_vm1, %v2358_v61 }
 0x12d   :  { %v520_v52 = vpop.f32.mrf.mxu2 }
 0x12e   :  { %v652_v58 = vpop.f32.mrf.mxu3  ;;  %v521_v2 = vadd.f32 %v520_v52, %v404_v34  ;;  %v407_v10 = vpop.f32.mrf.mxu1 }
 0x130   :  { %v2593_v29 = vadd.f32 %v652_v58, %v521_v2  ;;  %v719_v58 = vld [vmem:[#allocation2 + $0x120] sm:$0xff] }
 0x131   :  { %1931 = vmatmul.msk.f32.gmra.mxu1 %vm223_vm1, %v2375_v4  ;;  %1986 = vmatmul.msk.f32.gmra.mxu0 %vm223_vm1, %v2462_v50  ;;  %v2615_v9 = vpop.f32.mrf.mxu0 }
 0x132   :  { %1948 = vmatmul.msk.f32.gmra.mxu2 %vm223_vm1, %v2373_v3 }
 0x133   :  { %1965 = vmatmul.msk.f32.gmra.mxu3 %vm223_vm1, %v2377_v5 }
 0x135   :  { %v523_v47 = vpop.f32.mrf.mxu2 }
 0x136   :  { %v655_v55 = vpop.f32.mrf.mxu3  ;;  %v524_v56 = vadd.f32 %v523_v47, %v407_v10  ;;  %v410_v57 = vpop.f32.mrf.mxu1 }
 0x138   :  { %v2605_v62 = vadd.f32 %v655_v55, %v524_v56 }
 0x139   :  { %1932 = vmatmul.msk.f32.gmra.mxu1 %vm223_vm1, %v2394_v12  ;;  %1987 = vmatmul.msk.f32.gmra.mxu0 %vm223_vm1, %v2483_v1  ;;  %v2620_v12 = vld [vmem:[#allocation2 + $0x81] sm:$0xff]  ;;  %v2632_v33 = vpop.f32.mrf.mxu0 }
 0x13a   :  { %1949 = vmatmul.msk.f32.gmra.mxu2 %vm223_vm1, %v2392_v11 }
 0x13b   :  { %1966 = vmatmul.msk.f32.gmra.mxu3 %vm223_vm1, %v2396_v13 }
 0x13d   :  { %v526_v4 = vpop.f32.mrf.mxu2 }
 0x13e   :  { %v658_v63 = vpop.f32.mrf.mxu3  ;;  %v527_v7 = vadd.f32 %v526_v4, %v410_v57  ;;  %v413_v8 = vpop.f32.mrf.mxu1 }
 0x140   :  { %v2617_v14 = vadd.f32 %v658_v63, %v527_v7 }
 0x141   :  { %1933 = vmatmul.msk.f32.gmra.mxu1 %vm223_vm1, %v1155_v20  ;;  %1988 = vmatmul.msk.f32.gmra.mxu0 %vm223_vm1, %v2508_v18 }
 0x142   :  { %1950 = vmatmul.msk.f32.gmra.mxu2 %vm223_vm1, %v2620_v12 }
 0x143   :  { %1967 = vmatmul.msk.f32.gmra.mxu3 %vm223_vm1, %v2622_v15 }
 0x145   :  { %v529_v16 = vpop.f32.mrf.mxu2 }
 0x146   :  { %v530_v22 = vadd.f32 %v529_v16, %v413_v8  ;;  %v416_v23 = vpop.f32.mrf.mxu1  ;;  %v661_v24 = vpop.f32.mrf.mxu3  ;;  %v1649_v8 = vld [vmem:[%s3069_s7] sm:$0xf] }
 0x147   :  { %2027 = vmatpush.msk.msra.mxu3 %vm371_vm3, %v1649_v8 }
 0x148   :  { %v2630_v25 = vadd.f32 %v661_v24, %v530_v22  ;;  %v2706_v24 = vld [vmem:[#allocation2 + $0x121] sm:$0xff] }
 0x149   :  { %1934 = vmatmul.msk.f32.gmra.mxu1 %vm223_vm1, %v2424_v31  ;;  %1989 = vmatmul.msk.f32.gmra.mxu0 %vm223_vm1, %v2525_v27 }
 0x14a   :  { %1951 = vmatmul.msk.f32.gmra.mxu2 %vm223_vm1, %v2422_v30  ;;  %v2652_v30 = vpop.f32.mrf.mxu0 }
 0x14b   :  { %1968 = vmatmul.msk.f32.gmra.mxu3 %vm223_vm1, %v2426_v32 }
 0x14d   :  { %v532_v35 = vpop.f32.mrf.mxu2 }
 0x14e   :  { %v2642_v36 = vadd.f32 %v532_v35, %v416_v23  ;;  %v419_v37 = vpop.f32.mrf.mxu1  ;;  %v2708_v35 = vld [vmem:[#allocation2 + $0x122] sm:$0xff] }
 0x151   :  { %1935 = vmatmul.msk.f32.gmra.mxu1 %vm223_vm1, %v2443_v41  ;;  %1990 = vmatmul.msk.f32.gmra.mxu0 %vm223_vm1, %v2542_v44 }
 0x152   :  { %1952 = vmatmul.msk.f32.gmra.mxu2 %vm223_vm1, %v2441_v39  ;;  %v508_v41 = vpop.f32.mrf.mxu0 }
 0x153   :  { %1969 = vmatmul.msk.f32.gmra.mxu3 %vm223_vm1, %v2445_v42 }
 0x155   :  { %v535_v31 = vpop.f32.mrf.mxu2 }
 0x156   :  { %v2654_v32 = vadd.f32 %v535_v31, %v419_v37  ;;  %v422_v20 = vpop.f32.mrf.mxu1 }
 0x159   :  { %1936 = vmatmul.msk.f32.gmra.mxu1 %vm223_vm1, %v2462_v50  ;;  %1991 = vmatmul.msk.f32.gmra.mxu0 %vm223_vm1, %v719_v58 }
 0x15a   :  { %1953 = vmatmul.msk.f32.gmra.mxu2 %vm223_vm1, %v2460_v49  ;;  %v511_v47 = vpop.f32.mrf.mxu0 }
 0x15b   :  { %1970 = vmatmul.msk.f32.gmra.mxu3 %vm223_vm1, %v2464_v54 }
 0x15d   :  { %v538_v21 = vpop.f32.mrf.mxu2 }
 0x15e   :  { %v2662_v34 = vadd.f32 %v538_v21, %v422_v20  ;;  %v425_v52 = vpop.f32.mrf.mxu1 }
 0x161   :  { %1937 = vmatmul.msk.f32.gmra.mxu1 %vm223_vm1, %v2483_v1  ;;  %v1164_v1 = vld [vmem:[#allocation2 + $0x130] sm:$0xff] }
 0x162   :  { %1954 = vmatmul.msk.f32.gmra.mxu2 %vm223_vm1, %v2481_v0  ;;  %1992 = vmatmul.msk.f32.gmra.mxu0 %vm223_vm1, %v1164_v1  ;;  %v2682_v4 = vpop.f32.mrf.mxu0 }
 0x163   :  { %1971 = vmatmul.msk.f32.gmra.mxu3 %vm223_vm1, %v2485_v6 }
 0x165   :  { %v541_v50 = vpop.f32.mrf.mxu2 }
 0x166   :  { %v2671_v2 = vadd.f32 %v541_v50, %v425_v52  ;;  %v428_v10 = vpop.f32.mrf.mxu1 }
 0x169   :  { %1938 = vmatmul.msk.f32.gmra.mxu1 %vm223_vm1, %v2508_v18 }
 0x16a   :  { %1955 = vmatmul.msk.f32.gmra.mxu2 %vm223_vm1, %v2506_v17 }
 0x16b   :  { %1972 = vmatmul.msk.f32.gmra.mxu3 %vm223_vm1, %v2510_v19 }
 0x16d   :  { %v544_v55 = vpop.f32.mrf.mxu2 }
 0x16e   :  { %v2680_v56 = vadd.f32 %v544_v55, %v428_v10  ;;  %v431_v57 = vpop.f32.mrf.mxu1 }
 0x171   :  { %1939 = vmatmul.msk.f32.gmra.mxu1 %vm223_vm1, %v2525_v27  ;;  %v2702_v27 = vpop.f32.mrf.mxu0 }
 0x172   :  { %1956 = vmatmul.msk.f32.gmra.mxu2 %vm223_vm1, %v2523_v26 }
 0x173   :  { %1973 = vmatmul.msk.f32.gmra.mxu3 %vm223_vm1, %v2527_v28 }
 0x175   :  { %v547_v18 = vpop.f32.mrf.mxu2 }
 0x176   :  { %v2690_v63 = vadd.f32 %v547_v18, %v431_v57  ;;  %v434_v7 = vpop.f32.mrf.mxu1 }
 0x179   :  { %1940 = vmatmul.msk.f32.gmra.mxu1 %vm223_vm1, %v2542_v44  ;;  %v509_v44 = vadd.f32 %v508_v41, %v2603_v60  ;;  %v640_v37 = vpop.f32.mrf.mxu0  ;;  %v512_v60 = vadd.f32 %v511_v47, %v2615_v9 }
 0x17a   :  { %1957 = vmatmul.msk.f32.gmra.mxu2 %vm223_vm1, %v2540_v43 }
 0x17b   :  { %1974 = vmatmul.msk.f32.gmra.mxu3 %vm223_vm1, %v2544_v46  ;;  %v688_v52 = vadd.f32 %v640_v37, %v509_v44 }
 0x17d   :  { %v550_v16 = vpop.f32.mrf.mxu2 }
 0x17e   :  { %v2704_v22 = vadd.f32 %v550_v16, %v434_v7  ;;  %v437_v23 = vpop.f32.mrf.mxu1  ;;  %v664_v7 = vpop.f32.mrf.mxu3 }
 0x181   :  { %1941 = vmatmul.msk.f32.gmra.mxu1 %vm223_vm1, %v719_v58  ;;  %v643_v55 = vpop.f32.mrf.mxu0 }
 0x182   :  { %1958 = vmatmul.msk.f32.gmra.mxu2 %vm223_vm1, %v2706_v24  ;;  %v689_v41 = vadd.f32 %v643_v55, %v512_v60 }
 0x183   :  { %1975 = vmatmul.msk.f32.gmra.mxu3 %vm223_vm1, %v2708_v35 }
 0x185   :  { %v553_v31 = vpop.f32.mrf.mxu2 }
 0x186   :  { %v2716_v20 = vadd.f32 %v553_v31, %v437_v23  ;;  %v788_v21 = vpop.f32.mrf.mxu1  ;;  %v667_v47 = vpop.f32.mrf.mxu3 }
 0x187   :  { %v836_v58 = vadd.f32 %v788_v21, %v688_v52  ;;  %v697_v60 = vadd.f32 %v667_v47, %v2654_v32 }
 0x189   :  { %1994 = vmatmul.msk.f32.vlgmr.msra.gmra.mxu1 %vm223_vm1, %v2322_v40  ;;  %v646_v32 = vpop.f32.mrf.mxu0 }
 0x18a   :  { %2011 = vmatmul.msk.f32.vlgmr.msra.gmra.mxu2 %vm223_vm1, %v2439_v38 }
 0x18d   :  { %v936_v50 = vpop.f32.mrf.mxu2 }
 0x18e   :  { %v2722_v10 = vadd.f32 %v936_v50, %v836_v58  ;;  %v791_v1 = vpop.f32.mrf.mxu1 }
 0x18f   :  { %v837_v57 = vadd.f32 %v791_v1, %v689_v41 }
 0x191   :  { %1995 = vmatmul.msk.f32.gmra.mxu1 %vm223_vm1, %v2329_v45 }
 0x192   :  { %2012 = vmatmul.msk.f32.gmra.mxu2 %vm223_vm1, %v2458_v48 }
 0x195   :  { %v939_v40 = vpop.f32.mrf.mxu2 }
 0x196   :  { %v2729_v18 = vadd.f32 %v939_v40, %v837_v57  ;;  %v2731_v38 = vpop.f32.mrf.mxu1 }
 0x199   :  { %1996 = vmatmul.msk.f32.gmra.mxu1 %vm223_vm1, %v2336_v51  ;;  %v670_v51 = vpop.f32.mrf.mxu3 }
 0x19a   :  { %2013 = vmatmul.msk.f32.gmra.mxu2 %vm223_vm1, %v2340_v53 }
 0x19d   :  { %v2737_v9 = vpop.f32.mrf.mxu2 }
 0x19e   :  { %v2739_v45 = vpop.f32.mrf.mxu1 }
 0x1a1   :  { %1997 = vmatmul.msk.f32.gmra.mxu1 %vm223_vm1, %v2354_v59 }
 0x1a2   :  { %2014 = vmatmul.msk.f32.gmra.mxu2 %vm223_vm1, %v2358_v61  ;;  %v673_v61 = vpop.f32.mrf.mxu3 }
 0x1a5   :  { %v2745_v48 = vpop.f32.mrf.mxu2 }
 0x1a6   :  { %v800_v8 = vpop.f32.mrf.mxu1 }
 0x1a7   :  { %v840_v53 = vadd.f32 %v800_v8, %v2593_v29 }
 0x1a9   :  { %1998 = vmatmul.msk.f32.gmra.mxu1 %vm223_vm1, %v2373_v3 }
 0x1aa   :  { %2015 = vmatmul.msk.f32.gmra.mxu2 %vm223_vm1, %v2377_v5  ;;  %v676_v52 = vpop.f32.mrf.mxu3 }
 0x1ad   :  { %v948_v16 = vpop.f32.mrf.mxu2 }
 0x1ae   :  { %v2752_v23 = vadd.f32 %v948_v16, %v840_v53  ;;  %v803_v44 = vpop.f32.mrf.mxu1 }
 0x1af   :  { %v841_v59 = vadd.f32 %v803_v44, %v2605_v62  ;;  %v1452_v62 = vld [vmem:[#allocation2 + $0x92] sm:$0xff] }
 0x1b1   :  { %1999 = vmatmul.msk.f32.gmra.mxu1 %vm223_vm1, %v2392_v11 }
 0x1b2   :  { %2016 = vmatmul.msk.f32.gmra.mxu2 %vm223_vm1, %v2396_v13  ;;  %v1304_v13 = vld [vmem:[#allocation2 + $0x91] sm:$0xff]  ;;  %v679_v55 = vpop.f32.mrf.mxu3 }
 0x1b5   :  { %v951_v3 = vpop.f32.mrf.mxu2 }
 0x1b6   :  { %v2759_v37 = vadd.f32 %v951_v3, %v841_v59  ;;  %v806_v5 = vpop.f32.mrf.mxu1 }
 0x1b7   :  { %v842_v29 = vadd.f32 %v806_v5, %v2617_v14  ;;  %v701_v5 = vadd.f32 %v679_v55, %v2690_v63 }
 0x1b9   :  { %2000 = vmatmul.msk.f32.gmra.mxu1 %vm223_vm1, %v2620_v12  ;;  %v696_v12 = vadd.f32 %v664_v7, %v2642_v36  ;;  %v698_v7 = vadd.f32 %v670_v51, %v2662_v34  ;;  %v2799_v51 = vpop.f32.mrf.mxu0 }
 0x1ba   :  { %2017 = vmatmul.msk.f32.gmra.mxu2 %vm223_vm1, %v2622_v15  ;;  %v682_v36 = vpop.f32.mrf.mxu3 }
 0x1bd   :  { %v954_v31 = vpop.f32.mrf.mxu2 }
 0x1be   :  { %v2766_v11 = vadd.f32 %v954_v31, %v842_v29  ;;  %v809_v21 = vpop.f32.mrf.mxu1 }
 0x1bf   :  { %v843_v58 = vadd.f32 %v809_v21, %v2630_v25 }
 0x1c1   :  { %2001 = vmatmul.msk.f32.gmra.mxu1 %vm223_vm1, %v1304_v13 }
 0x1c2   :  { %2018 = vmatmul.msk.f32.gmra.mxu2 %vm223_vm1, %v1452_v62  ;;  %v685_v47 = vpop.f32.mrf.mxu3 }
 0x1c5   :  { %v957_v50 = vpop.f32.mrf.mxu2 }
 0x1c6   :  { %v2772_v1 = vadd.f32 %v957_v50, %v843_v58  ;;  %v812_v15 = vpop.f32.mrf.mxu1 }
 0x1c7   :  { %v844_v14 = vadd.f32 %v812_v15, %v696_v12 }
 0x1c9   :  { %2002 = vmatmul.msk.f32.gmra.mxu1 %vm223_vm1, %v2441_v39 }
 0x1ca   :  { %2019 = vmatmul.msk.f32.gmra.mxu2 %vm223_vm1, %v2445_v42 }
 0x1cd   :  { %v960_v41 = vpop.f32.mrf.mxu2 }
 0x1ce   :  { %v2779_v57 = vadd.f32 %v960_v41, %v844_v14  ;;  %v815_v25 = vpop.f32.mrf.mxu1  ;;  %v1460_v14 = vld [vmem:[#allocation2 + $0x132] sm:$0xff] }
 0x1cf   :  { %v845_v40 = vadd.f32 %v815_v25, %v697_v60 }
 0x1d1   :  { %2003 = vmatmul.msk.f32.gmra.mxu1 %vm223_vm1, %v2460_v49  ;;  %v699_v49 = vadd.f32 %v673_v61, %v2671_v2  ;;  %v1084_v61 = vpop.f32.mrf.mxu3 }
 0x1d2   :  { %2020 = vmatmul.msk.f32.gmra.mxu2 %vm223_vm1, %v2464_v54  ;;  %v1132_v41 = vadd.f32 %v1084_v61, %v2722_v10  ;;  %v2841_v10 = vld [vmem:[%s3071_s6] ss:$0 sm:$0xff] }
 0x1d5   :  { %v963_v39 = vpop.f32.mrf.mxu2 }
 0x1d6   :  { %v2786_v8 = vadd.f32 %v963_v39, %v845_v40  ;;  %v818_v42 = vpop.f32.mrf.mxu1  ;;  %v2835_v39 = vld [vmem:[%s3070_s5] ss:$0 sm:$0xff] }
 0x1d7   :  { %v846_v53 = vadd.f32 %v818_v42, %v698_v7 }
 0x1d9   :  { %2004 = vmatmul.msk.f32.gmra.mxu1 %vm223_vm1, %v2481_v0  ;;  %v700_v0 = vadd.f32 %v676_v52, %v2680_v56  ;;  %v1087_v21 = vpop.f32.mrf.mxu3 }
 0x1da   :  { %2021 = vmatmul.msk.f32.gmra.mxu2 %vm223_vm1, %v2485_v6 }
 0x1dd   :  { %v966_v16 = vpop.f32.mrf.mxu2 }
 0x1de   :  { %v2793_v54 = vadd.f32 %v966_v16, %v846_v53  ;;  %v821_v44 = vpop.f32.mrf.mxu1 }
 0x1df   :  { %v847_v34 = vadd.f32 %v821_v44, %v699_v49  ;;  %v1133_v49 = vadd.f32 %v1087_v21, %v2729_v18  ;;  %v518_v18 = vadd.f32 %v2702_v27, %v2652_v30 }
 0x1e1   :  { %2005 = vmatmul.msk.f32.gmra.mxu1 %vm223_vm1, %v2506_v17  ;;  %v1233_v17 = vpop.f32.mrf.mxu0  ;;  %v1090_v58 = vpop.f32.mrf.mxu3 }
 0x1e2   :  { %2022 = vmatmul.msk.f32.gmra.mxu2 %vm223_vm1, %v2510_v19 }
 0x1e5   :  { %v969_v59 = vpop.f32.mrf.mxu2 }
 0x1e6   :  { %v2802_v6 = vadd.f32 %v969_v59, %v847_v34  ;;  %v824_v2 = vpop.f32.mrf.mxu1 }
 0x1e7   :  { %v848_v3 = vadd.f32 %v824_v2, %v700_v0 }
 0x1e9   :  { %2006 = vmatmul.msk.f32.gmra.mxu1 %vm223_vm1, %v2523_v26  ;;  %v702_v26 = vadd.f32 %v682_v36, %v2704_v22  ;;  %v1236_v62 = vpop.f32.mrf.mxu0  ;;  %v1312_v22 = vld [vmem:[#allocation2 + $0x131] sm:$0xff]  ;;  %v1093_v60 = vpop.f32.mrf.mxu3  ;;  %v515_v36 = vadd.f32 %v2682_v4, %v2632_v33 }
 0x1ea   :  { %2023 = vmatmul.msk.f32.gmra.mxu2 %vm223_vm1, %v2527_v28  ;;  %v1282_v59 = vadd.f32 %v1236_v62, %v1133_v49 }
 0x1eb   :  { %v690_v53 = vadd.f32 %v646_v32, %v515_v36 }
 0x1ed   :  { %v972_v19 = vpop.f32.mrf.mxu2  ;;  %v838_v33 = vadd.f32 %v2731_v38, %v690_v53 }
 0x1ee   :  { %v2809_v29 = vadd.f32 %v972_v19, %v848_v3  ;;  %v827_v31 = vpop.f32.mrf.mxu1 }
 0x1ef   :  { %v849_v56 = vadd.f32 %v827_v31, %v701_v5  ;;  %v986_v34 = vadd.f32 %v2737_v9, %v838_v33 }
 0x1f1   :  { %2007 = vmatmul.msk.f32.gmra.mxu1 %vm223_vm1, %v2540_v43  ;;  %v703_v43 = vadd.f32 %v685_v47, %v2716_v20  ;;  %v1239_v55 = vpop.f32.mrf.mxu0  ;;  %v1281_v20 = vadd.f32 %v1233_v17, %v1132_v41  ;;  %v1096_v44 = vpop.f32.mrf.mxu3  ;;  %v691_v17 = vadd.f32 %v2799_v51, %v518_v18  ;;  %v1134_v5 = vadd.f32 %v1090_v58, %v986_v34 }
 0x1f2   :  { %2024 = vmatmul.msk.f32.gmra.mxu2 %vm223_vm1, %v2544_v46 }
 0x1f3   :  { %v839_v31 = vadd.f32 %v2739_v45, %v691_v17  ;;  %v1283_v27 = vadd.f32 %v1239_v55, %v1134_v5 }
 0x1f5   :  { %v975_v13 = vpop.f32.mrf.mxu2  ;;  %v987_v21 = vadd.f32 %v2745_v48, %v839_v31 }
 0x1f6   :  { %v2816_v52 = vadd.f32 %v975_v13, %v849_v56  ;;  %v830_v28 = vpop.f32.mrf.mxu1 }
 0x1f7   :  { %v850_v63 = vadd.f32 %v830_v28, %v702_v26  ;;  %v1135_v62 = vadd.f32 %v1093_v60, %v987_v21 }
 0x1f9   :  { %2008 = vmatmul.msk.f32.gmra.mxu1 %vm223_vm1, %v2706_v24  ;;  %v1242_v40 = vpop.f32.mrf.mxu0  ;;  %v1099_v56 = vpop.f32.mrf.mxu3 }
 0x1fa   :  { %2025 = vmatmul.msk.f32.gmra.mxu2 %vm223_vm1, %v2708_v35  ;;  %v1137_v53 = vadd.f32 %v1099_v56, %v2759_v37 }
 0x1fd   :  { %v978_v12 = vpop.f32.mrf.mxu2 }
 0x1fe   :  { %v2823_v50 = vadd.f32 %v978_v12, %v850_v63  ;;  %v833_v46 = vpop.f32.mrf.mxu1  ;;  %v1284_v12 = vadd.f32 %v1242_v40, %v1135_v62 }
 0x1ff   :  { %v851_v15 = vadd.f32 %v833_v46, %v703_v43 }
 0x201   :  { %2009 = vmatmul.msk.f32.gmra.mxu1 %vm223_vm1, %v1312_v22  ;;  %v1245_v61 = vpop.f32.mrf.mxu0  ;;  %v1102_v46 = vpop.f32.mrf.mxu3 }
 0x202   :  { %2026 = vmatmul.msk.f32.gmra.mxu2 %vm223_vm1, %v1460_v14  ;;  %v1136_v14 = vadd.f32 %v1096_v44, %v2752_v23 }
 0x205   :  { %v981_v24 = vpop.f32.mrf.mxu2 }
 0x206   :  { %v2828_v35 = vadd.f32 %v981_v24, %v851_v15  ;;  %v1381_v25 = vpop.f32.mrf.mxu1 }
 0x207   :  { %v1429_v7 = vadd.f32 %v1381_v25, %v1281_v20  ;;  %v1285_v20 = vadd.f32 %v1245_v61, %v1136_v14 }
 0x209   :  { %v1248_v58 = vpop.f32.mrf.mxu0 }
 0x20a   :  { %v1286_v44 = vadd.f32 %v1248_v58, %v1137_v53 }
 0x20d   :  { %v1529_v42 = vpop.f32.mrf.mxu2 }
 0x20e   :  { %v1577_v47 = vadd.f32 %v1529_v42, %v1429_v7  ;;  %v1384_v16 = vpop.f32.mrf.mxu1  ;;  %v1105_v42 = vpop.f32.mrf.mxu3 }
 0x20f   :  { %v1430_v2 = vadd.f32 %v1384_v16, %v1282_v59  ;;  %v1138_v59 = vadd.f32 %v1102_v46, %v2766_v11  ;;  %v1139_v31 = vadd.f32 %v1105_v42, %v2772_v1 }
 0x210   :  { %v1597_v4 = vmul.f32 %v2835_v39, %v1577_v47 }
 0x211   :  { %v1251_v41 = vpop.f32.mrf.mxu0 }
 0x212   :  { %v1617_v0 = vadd.f32 %v2841_v10, %v1597_v4 }
 0x214   :  { %v1633_v32 = vmax.f32 %v1617_v0, 0.0 }
 0x215   :  { %v1532_v3 = vpop.f32.mrf.mxu2 }
 0x216   :  { %v1578_v19 = vadd.f32 %v1532_v3, %v1430_v2  ;;  %2028 = vmatmul.msk.f32.vlgmr.msra.gmra.mxu3 %vm223_vm1, %v1633_v32  ;;  %v1387_v38 = vpop.f32.mrf.mxu1  ;;  %v1108_v37 = vpop.f32.mrf.mxu3  ;;  %v1287_v3 = vadd.f32 %v1251_v41, %v1138_v59 }
 0x217   :  { %v1431_v13 = vadd.f32 %v1387_v38, %v1283_v27  ;;  %v1140_v62 = vadd.f32 %v1108_v37, %v2779_v57 }
 0x218   :  { %v1598_v9 = vmul.f32 %v2835_v39, %v1578_v19 }
 0x219   :  { %v1254_v33 = vpop.f32.mrf.mxu0 }
 0x21a   :  { %v1618_v30 = vadd.f32 %v2841_v10, %v1598_v9  ;;  %v1288_v27 = vadd.f32 %v1254_v33, %v1139_v31 }
 0x21c   :  { %v1634_v26 = vmax.f32 %v1618_v30, 0.0 }
 0x21d   :  { %v1535_v28 = vpop.f32.mrf.mxu2 }
 0x21e   :  { %v1579_v51 = vadd.f32 %v1535_v28, %v1431_v13  ;;  %2029 = vmatmul.msk.f32.gmra.mxu3 %vm223_vm1, %v1634_v26  ;;  %v1390_v63 = vpop.f32.mrf.mxu1  ;;  %v1111_v21 = vpop.f32.mrf.mxu3 }
 0x21f   :  { %v1432_v48 = vadd.f32 %v1390_v63, %v1284_v12 }
 0x220   :  { %v1599_v43 = vmul.f32 %v2835_v39, %v1579_v51 }
 0x221   :  { %v1257_v19 = vpop.f32.mrf.mxu0 }
 0x222   :  { %v1619_v45 = vadd.f32 %v2841_v10, %v1599_v43 }
 0x224   :  { %v1635_v22 = vmax.f32 %v1619_v45, 0.0  ;;  %v1289_v45 = vadd.f32 %v1257_v19, %v1140_v62 }
 0x225   :  { %v1538_v15 = vpop.f32.mrf.mxu2 }
 0x226   :  { %v1580_v55 = vadd.f32 %v1538_v15, %v1432_v48  ;;  %2030 = vmatmul.msk.f32.gmra.mxu3 %vm223_vm1, %v1635_v22  ;;  %v1393_v60 = vpop.f32.mrf.mxu1  ;;  %v1114_v12 = vpop.f32.mrf.mxu3  ;;  %v1141_v15 = vadd.f32 %v1111_v21, %v2786_v8 }
 0x227   :  { %v1433_v7 = vadd.f32 %v1393_v60, %v1285_v20  ;;  %v1142_v42 = vadd.f32 %v1114_v12, %v2793_v54 }
 0x228   :  { %v1600_v24 = vmul.f32 %v2835_v39, %v1580_v55 }
 0x229   :  { %v1260_v1 = vpop.f32.mrf.mxu0 }
 0x22a   :  { %v1620_v25 = vadd.f32 %v2841_v10, %v1600_v24  ;;  %v1290_v41 = vadd.f32 %v1260_v1, %v1141_v15 }
 0x22c   :  { %v1636_v36 = vmax.f32 %v1620_v25, 0.0 }
 0x22d   :  { %v1541_v40 = vpop.f32.mrf.mxu2 }
 0x22e   :  { %v1581_v49 = vadd.f32 %v1541_v40, %v1433_v7  ;;  %2031 = vmatmul.msk.f32.gmra.mxu3 %vm223_vm1, %v1636_v36  ;;  %v1396_v23 = vpop.f32.mrf.mxu1  ;;  %v1117_v36 = vpop.f32.mrf.mxu3 }
 0x22f   :  { %v1434_v34 = vadd.f32 %v1396_v23, %v1286_v44 }
 0x230   :  { %v1601_v47 = vmul.f32 %v2835_v39, %v1581_v49 }
 0x231   :  { %v1263_v60 = vpop.f32.mrf.mxu0 }
 0x232   :  { %v1621_v16 = vadd.f32 %v2841_v10, %v1601_v47  ;;  %v1291_v23 = vadd.f32 %v1263_v60, %v1142_v42 }
 0x234   :  { %v1637_v4 = vmax.f32 %v1621_v16, 0.0 }
 0x235   :  { %v1544_v0 = vpop.f32.mrf.mxu2 }
 0x236   :  { %v1582_v18 = vadd.f32 %v1544_v0, %v1434_v34  ;;  %2032 = vmatmul.msk.f32.gmra.mxu3 %vm223_vm1, %v1637_v4  ;;  %v1399_v32 = vpop.f32.mrf.mxu1  ;;  %v1143_v4 = vadd.f32 %v1117_v36, %v2802_v6  ;;  %v1120_v54 = vpop.f32.mrf.mxu3 }
 0x237   :  { %v1435_v5 = vadd.f32 %v1399_v32, %v1287_v3 }
 0x238   :  { %v1602_v2 = vmul.f32 %v2835_v39, %v1582_v18 }
 0x239   :  { %v1266_v47 = vpop.f32.mrf.mxu0 }
 0x23a   :  { %v1622_v61 = vadd.f32 %v2841_v10, %v1602_v2  ;;  %v1292_v32 = vadd.f32 %v1266_v47, %v1143_v4  ;;  %v2918_v47 = vld [vmem:[%s3073_s9] ss:$0 sm:$0xff] }
 0x23c   :  { %v1638_v17 = vmax.f32 %v1622_v61, 0.0 }
 0x23d   :  { %v1547_v38 = vpop.f32.mrf.mxu2 }
 0x23e   :  { %v1583_v9 = vadd.f32 %v1547_v38, %v1435_v5  ;;  %2033 = vmatmul.msk.f32.gmra.mxu3 %vm223_vm1, %v1638_v17  ;;  %v1402_v11 = vpop.f32.mrf.mxu1  ;;  %v1144_v17 = vadd.f32 %v1120_v54, %v2809_v29  ;;  %v1123_v38 = vpop.f32.mrf.mxu3 }
 0x23f   :  { %v1436_v13 = vadd.f32 %v1402_v11, %v1288_v27 }
 0x240   :  { %v1603_v56 = vmul.f32 %v2835_v39, %v1583_v9 }
 0x241   :  { %v1269_v61 = vpop.f32.mrf.mxu0 }
 0x242   :  { %v1623_v30 = vadd.f32 %v2841_v10, %v1603_v56  ;;  %v1293_v9 = vadd.f32 %v1269_v61, %v1144_v17 }
 0x244   :  { %v1639_v26 = vmax.f32 %v1623_v30, 0.0  ;;  %v1145_v30 = vadd.f32 %v1123_v38, %v2816_v52 }
 0x245   :  { %v1550_v28 = vpop.f32.mrf.mxu2 }
 0x246   :  { %v1584_v51 = vadd.f32 %v1550_v28, %v1436_v13  ;;  %2034 = vmatmul.msk.f32.gmra.mxu3 %vm223_vm1, %v1639_v26  ;;  %v1405_v63 = vpop.f32.mrf.mxu1 }
 0x247   :  { %v1437_v22 = vadd.f32 %v1405_v63, %v1289_v45 }
 0x248   :  { %v1604_v58 = vmul.f32 %v2835_v39, %v1584_v51  ;;  %v1126_v51 = vpop.f32.mrf.mxu3 }
 0x249   :  { %v1272_v29 = vpop.f32.mrf.mxu0 }
 0x24a   :  { %v1624_v43 = vadd.f32 %v2841_v10, %v1604_v58  ;;  %v1294_v62 = vadd.f32 %v1272_v29, %v1145_v30 }
 0x24c   :  { %v1640_v46 = vmax.f32 %v1624_v43, 0.0  ;;  %v1146_v43 = vadd.f32 %v1126_v51, %v2823_v50  ;;  %v2059_v51 = vld [vmem:[%s3065_s0 + $0x28] sm:$0xff] }
 0x24d   :  { %v1553_v48 = vpop.f32.mrf.mxu2 }
 0x24e   :  { %v1585_v14 = vadd.f32 %v1553_v48, %v1437_v22  ;;  %2035 = vmatmul.msk.f32.gmra.mxu3 %vm223_vm1, %v1640_v46  ;;  %v1408_v57 = vpop.f32.mrf.mxu1 }
 0x24f   :  { %v1438_v20 = vadd.f32 %v1408_v57, %v1290_v41 }
 0x250   :  { %v1605_v55 = vmul.f32 %v2835_v39, %v1585_v14  ;;  %v1129_v57 = vpop.f32.mrf.mxu3 }
 0x251   :  { %v1275_v52 = vpop.f32.mrf.mxu0  ;;  %v1147_v60 = vadd.f32 %v1129_v57, %v2828_v35 }
 0x252   :  { %v1625_v24 = vadd.f32 %v2841_v10, %v1605_v55  ;;  %v1295_v22 = vadd.f32 %v1275_v52, %v1146_v43  ;;  %v2060_v52 = vld [vmem:[%s3065_s0 + $0x30] sm:$0xff] }
 0x254   :  { %v1641_v25 = vmax.f32 %v1625_v24, 0.0 }
 0x255   :  { %v1556_v7 = vpop.f32.mrf.mxu2 }
 0x256   :  { %v1586_v40 = vadd.f32 %v1556_v7, %v1438_v20  ;;  %2036 = vmatmul.msk.f32.gmra.mxu3 %vm223_vm1, %v1641_v25  ;;  %v1411_v8 = vpop.f32.mrf.mxu1 }
 0x257   :  { %v1439_v44 = vadd.f32 %v1411_v8, %v1291_v23  ;;  %v2913_v23 = vld [vmem:[%s3072_s8] ss:$0 sm:$0xff] }
 0x258   :  { %v1606_v53 = vmul.f32 %v2835_v39, %v1586_v40 }
 0x259   :  { %v1278_v50 = vpop.f32.mrf.mxu0 }
 0x25a   :  { %v1626_v49 = vadd.f32 %v2841_v10, %v1606_v53  ;;  %v1296_v20 = vadd.f32 %v1278_v50, %v1147_v60 }
 0x25c   :  { %v1642_v16 = vmax.f32 %v1626_v49, 0.0 }
 0x25d   :  { %v1559_v33 = vpop.f32.mrf.mxu2 }
 0x25e   :  { %v1587_v34 = vadd.f32 %v1559_v33, %v1439_v44  ;;  %2037 = vmatmul.msk.f32.gmra.mxu3 %vm223_vm1, %v1642_v16  ;;  %v1414_v0 = vpop.f32.mrf.mxu1 }
 0x25f   :  { %v1440_v2 = vadd.f32 %v1414_v0, %v1292_v32 }
 0x260   :  { %v1607_v59 = vmul.f32 %v2835_v39, %v1587_v34 }
 0x262   :  { %v1627_v18 = vadd.f32 %v2841_v10, %v1607_v59  ;;  %v2055_v59 = vld [vmem:[%s3065_s0 + $0x8] sm:$0xff] }
 0x264   :  { %v1643_v37 = vmax.f32 %v1627_v18, 0.0 }
 0x265   :  { %v1562_v3 = vpop.f32.mrf.mxu2 }
 0x266   :  { %v1588_v5 = vadd.f32 %v1562_v3, %v1440_v2  ;;  %2038 = vmatmul.msk.f32.gmra.mxu3 %vm223_vm1, %v1643_v37  ;;  %v1417_v6 = vpop.f32.mrf.mxu1  ;;  %v2056_v3 = vld [vmem:[%s3065_s0 + $0x10] sm:$0xff] }
 0x267   :  { %v1441_v56 = vadd.f32 %v1417_v6, %v1293_v9 }
 0x268   :  { %v1608_v19 = vmul.f32 %v2835_v39, %v1588_v5 }
 0x26a   :  { %v1628_v31 = vadd.f32 %v2841_v10, %v1608_v19 }
 0x26c   :  { %v1644_v11 = vmax.f32 %v1628_v31, 0.0  ;;  %v2057_v31 = vld [vmem:[%s3065_s0 + $0x18] sm:$0xff] }
 0x26d   :  { %v1565_v21 = vpop.f32.mrf.mxu2 }
 0x26e   :  { %v1589_v27 = vadd.f32 %v1565_v21, %v1441_v56  ;;  %2039 = vmatmul.msk.f32.gmra.mxu3 %vm223_vm1, %v1644_v11  ;;  %v1420_v26 = vpop.f32.mrf.mxu1 }
 0x26f   :  { %v1442_v1 = vadd.f32 %v1420_v26, %v1294_v62 }
 0x270   :  { %v1609_v13 = vmul.f32 %v2835_v39, %v1589_v27  ;;  %v2058_v27 = vld [vmem:[%s3065_s0 + $0x20] sm:$0xff] }
 0x272   :  { %v1629_v28 = vadd.f32 %v2841_v10, %v1609_v13 }
 0x274   :  { %v1645_v63 = vmax.f32 %v1629_v28, 0.0 }
 0x275   :  { %v1568_v58 = vpop.f32.mrf.mxu2 }
 0x276   :  { %v1590_v45 = vadd.f32 %v1568_v58, %v1442_v1  ;;  %2040 = vmatmul.msk.f32.gmra.mxu3 %vm223_vm1, %v1645_v63  ;;  %v1423_v12 = vpop.f32.mrf.mxu1 }
 0x277   :  { %v1443_v14 = vadd.f32 %v1423_v12, %v1295_v22 }
 0x278   :  { %v1610_v46 = vmul.f32 %v2835_v39, %v1590_v45 }
 0x27a   :  { %v1630_v48 = vadd.f32 %v2841_v10, %v1610_v46 }
 0x27c   :  { %v1646_v15 = vmax.f32 %v1630_v48, 0.0 }
 0x27d   :  { %v1571_v55 = vpop.f32.mrf.mxu2 }
 0x27e   :  { %v1591_v24 = vadd.f32 %v1571_v55, %v1443_v14  ;;  %2041 = vmatmul.msk.f32.gmra.mxu3 %vm223_vm1, %v1646_v15  ;;  %v1426_v25 = vpop.f32.mrf.mxu1  ;;  %v2061_v14 = vld [vmem:[%s3065_s0 + $0x38] sm:$0xff] }
 0x27f   :  { %v1444_v42 = vadd.f32 %v1426_v25, %v1296_v20 }
 0x280   :  { %v1611_v41 = vmul.f32 %v2835_v39, %v1591_v24 }
 0x282   :  { %v1631_v36 = vadd.f32 %v2841_v10, %v1611_v41  ;;  %v2062_v41 = vld [vmem:[%s3065_s0 + $0x40] sm:$0xff] }
 0x284   :  { %v1647_v7 = vmax.f32 %v1631_v36, 0.0 }
 0x285   :  { %v1574_v40 = vpop.f32.mrf.mxu2 }
 0x286   :  { %v1592_v8 = vadd.f32 %v1574_v40, %v1444_v42  ;;  %2042 = vmatmul.msk.f32.gmra.mxu3 %vm223_vm1, %v1647_v7  ;;  %v2063_v40 = vld [vmem:[%s3065_s0 + $0x48] sm:$0xff] }
 0x288   :  { %v1612_v53 = vmul.f32 %v2835_v39, %v1592_v8 }
 0x28a   :  { %v1632_v35 = vadd.f32 %v2841_v10, %v1612_v53  ;;  %v2054_v10 = vld [vmem:[%s3065_s0] sm:$0xff] }
 0x28c   :  { %v1648_v49 = vmax.f32 %v1632_v35, 0.0 }
 0x28e   :  { %2043 = vmatmul.msk.f32.gmra.mxu3 %vm223_vm1, %v1648_v49 }
 0x299   :  { %v1718_v16 = vpop.f32.mrf.mxu3 }
 0x29a   :  { %v1770_v44 = vmul.f32 %v2913_v23, %v1718_v16 }
 0x29c   :  { %v1790_v39 = vadd.f32 %v2918_v47, %v1770_v44  ;;  %v2064_v44 = vld [vmem:[%s3065_s0 + $0x50] sm:$0xff] }
 0x29e   :  { %v1806_v33 = vadd.f32 %v2054_v10, %v1790_v39 }
 0x2a0   :  { %v1822_v4 = vmax.f32 %v1806_v33, 0.0 }
 0x2a1   :  { %v1721_v34 = vpop.f32.mrf.mxu3 }
 0x2a2   :  { %1838 = vst.msk [vmem:[%s3074_s10] sm:$0xff] %vm53_vm0, %v1822_v4  ;;  %v1771_v0 = vmul.f32 %v2913_v23, %v1721_v34 }
 0x2a4   :  { %v1791_v54 = vadd.f32 %v2918_v47, %v1771_v0  ;;  %v2065_v0 = vld [vmem:[%s3065_s0 + $0x58] sm:$0xff] }
 0x2a6   :  { %v1807_v18 = vadd.f32 %v2055_v59, %v1791_v54 }
 0x2a8   :  { %v1823_v32 = vmax.f32 %v1807_v18, 0.0 }
 0x2a9   :  { %v1724_v37 = vpop.f32.mrf.mxu3 }
 0x2aa   :  { %1839 = vst.msk [vmem:[%s3074_s10 + $0x8] sm:$0xff] %vm53_vm0, %v1823_v32  ;;  %v1772_v2 = vmul.f32 %v2913_v23, %v1724_v37 }
 0x2ac   :  { %v1792_v61 = vadd.f32 %v2918_v47, %v1772_v2  ;;  %v2066_v2 = vld [vmem:[%s3065_s0 + $0x60] sm:$0xff] }
 0x2ae   :  { %v1808_v17 = vadd.f32 %v2056_v3, %v1792_v61 }
 0x2b0   :  { %v1824_v5 = vmax.f32 %v1808_v17, 0.0 }
 0x2b1   :  { %v1727_v6 = vpop.f32.mrf.mxu3 }
 0x2b2   :  { %1840 = vst.msk [vmem:[%s3074_s10 + $0x10] sm:$0xff] %vm53_vm0, %v1824_v5  ;;  %v1773_v19 = vmul.f32 %v2913_v23, %v1727_v6 }
 0x2b4   :  { %v1793_v38 = vadd.f32 %v2918_v47, %v1773_v19  ;;  %v2067_v19 = vld [vmem:[%s3065_s0 + $0x68] sm:$0xff] }
 0x2b6   :  { %v1809_v9 = vadd.f32 %v2057_v31, %v1793_v38 }
 0x2b8   :  { %v1825_v11 = vmax.f32 %v1809_v9, 0.0 }
 0x2b9   :  { %v1730_v56 = vpop.f32.mrf.mxu3 }
 0x2ba   :  { %1841 = vst.msk [vmem:[%s3074_s10 + $0x18] sm:$0xff] %vm53_vm0, %v1825_v11  ;;  %v1774_v21 = vmul.f32 %v2913_v23, %v1730_v56 }
 0x2bc   :  { %v1794_v30 = vadd.f32 %v2918_v47, %v1774_v21  ;;  %v2068_v21 = vld [vmem:[%s3065_s0 + $0x70] sm:$0xff] }
 0x2be   :  { %v1810_v26 = vadd.f32 %v2058_v27, %v1794_v30 }
 0x2c0   :  { %v1826_v29 = vmax.f32 %v1810_v26, 0.0 }
 0x2c1   :  { %v1733_v13 = vpop.f32.mrf.mxu3 }
 0x2c2   :  { %1842 = vst.msk [vmem:[%s3074_s10 + $0x20] sm:$0xff] %vm53_vm0, %v1826_v29  ;;  %v1775_v28 = vmul.f32 %v2913_v23, %v1733_v13 }
 0x2c4   :  { %v1795_v62 = vadd.f32 %v2918_v47, %v1775_v28  ;;  %v2069_v28 = vld [vmem:[%s3065_s0 + $0x78] sm:$0xff] }
 0x2c6   :  { %v1811_v63 = vadd.f32 %v2059_v51, %v1795_v62 }
 0x2c8   :  { %v1827_v1 = vmax.f32 %v1811_v63, 0.0 }
 0x2c9   :  { %v1736_v58 = vpop.f32.mrf.mxu3 }
 0x2ca   :  { %1843 = vst.msk [vmem:[%s3074_s10 + $0x28] sm:$0xff] %vm53_vm0, %v1827_v1  ;;  %v1776_v43 = vmul.f32 %v2913_v23, %v1736_v58 }
 0x2cc   :  { %v1796_v45 = vadd.f32 %v2918_v47, %v1776_v43 }
 0x2ce   :  { %v1812_v12 = vadd.f32 %v2060_v52, %v1796_v45 }
 0x2d0   :  { %v1828_v46 = vmax.f32 %v1812_v12, 0.0 }
 0x2d1   :  { %v1739_v22 = vpop.f32.mrf.mxu3 }
 0x2d2   :  { %1844 = vst.msk [vmem:[%s3074_s10 + $0x30] sm:$0xff] %vm53_vm0, %v1828_v46  ;;  %v1777_v48 = vmul.f32 %v2913_v23, %v1739_v22 }
 0x2d4   :  { %v1797_v15 = vadd.f32 %v2918_v47, %v1777_v48 }
 0x2d6   :  { %v1813_v57 = vadd.f32 %v2061_v14, %v1797_v15 }
 0x2d8   :  { %v1829_v55 = vmax.f32 %v1813_v57, 0.0 }
 0x2d9   :  { %v1742_v60 = vpop.f32.mrf.mxu3 }
 0x2da   :  { %1845 = vst.msk [vmem:[%s3074_s10 + $0x38] sm:$0xff] %vm53_vm0, %v1829_v55  ;;  %v1778_v24 = vmul.f32 %v2913_v23, %v1742_v60 }
 0x2dc   :  { %v1798_v50 = vadd.f32 %v2918_v47, %v1778_v24 }
 0x2de   :  { %v1814_v25 = vadd.f32 %v2062_v41, %v1798_v50 }
 0x2e0   :  { %v1830_v20 = vmax.f32 %v1814_v25, 0.0 }
 0x2e1   :  { %v1745_v36 = vpop.f32.mrf.mxu3 }
 0x2e2   :  { %1846 = vst.msk [vmem:[%s3074_s10 + $0x40] sm:$0xff] %vm53_vm0, %v1830_v20  ;;  %v1779_v7 = vmul.f32 %v2913_v23, %v1745_v36 }
 0x2e4   :  { %v1799_v42 = vadd.f32 %v2918_v47, %v1779_v7 }
 0x2e6   :  { %v1815_v8 = vadd.f32 %v2063_v40, %v1799_v42 }
 0x2e8   :  { %v1831_v53 = vmax.f32 %v1815_v8, 0.0 }
 0x2e9   :  { %v1748_v35 = vpop.f32.mrf.mxu3 }
 0x2ea   :  { %1847 = vst.msk [vmem:[%s3074_s10 + $0x48] sm:$0xff] %vm53_vm0, %v1831_v53  ;;  %v1780_v49 = vmul.f32 %v2913_v23, %v1748_v35 }
 0x2ec   :  { %v1800_v16 = vadd.f32 %v2918_v47, %v1780_v49 }
 0x2ee   :  { %v1816_v39 = vadd.f32 %v2064_v44, %v1800_v16 }
 0x2f0   :  { %v1832_v10 = vmax.f32 %v1816_v39, 0.0 }
 0x2f1   :  { %v1751_v33 = vpop.f32.mrf.mxu3 }
 0x2f2   :  { %1848 = vst.msk [vmem:[%s3074_s10 + $0x50] sm:$0xff] %vm53_vm0, %v1832_v10  ;;  %v1781_v4 = vmul.f32 %v2913_v23, %v1751_v33 }
 0x2f4   :  { %v1801_v34 = vadd.f32 %v2918_v47, %v1781_v4 }
 0x2f6   :  { %v1817_v54 = vadd.f32 %v2065_v0, %v1801_v34 }
 0x2f8   :  { %v1833_v59 = vmax.f32 %v1817_v54, 0.0 }
 0x2f9   :  { %v1754_v18 = vpop.f32.mrf.mxu3 }
 0x2fa   :  { %1849 = vst.msk [vmem:[%s3074_s10 + $0x58] sm:$0xff] %vm53_vm0, %v1833_v59  ;;  %v1782_v32 = vmul.f32 %v2913_v23, %v1754_v18 }
 0x2fc   :  { %v1802_v37 = vadd.f32 %v2918_v47, %v1782_v32 }
 0x2fe   :  { %v1818_v61 = vadd.f32 %v2066_v2, %v1802_v37 }
 0x300   :  { %v1834_v3 = vmax.f32 %v1818_v61, 0.0 }
 0x301   :  { %v1757_v17 = vpop.f32.mrf.mxu3 }
 0x302   :  { %1850 = vst.msk [vmem:[%s3074_s10 + $0x60] sm:$0xff] %vm53_vm0, %v1834_v3  ;;  %v1783_v5 = vmul.f32 %v2913_v23, %v1757_v17 }
 0x304   :  { %v1803_v6 = vadd.f32 %v2918_v47, %v1783_v5 }
 0x306   :  { %v1819_v38 = vadd.f32 %v2067_v19, %v1803_v6 }
 0x308   :  { %v1835_v31 = vmax.f32 %v1819_v38, 0.0 }
 0x309   :  { %v1760_v9 = vpop.f32.mrf.mxu3 }
 0x30a   :  { %1851 = vst.msk [vmem:[%s3074_s10 + $0x68] sm:$0xff] %vm53_vm0, %v1835_v31  ;;  %v1784_v11 = vmul.f32 %v2913_v23, %v1760_v9 }
 0x30c   :  { %v1804_v56 = vadd.f32 %v2918_v47, %v1784_v11 }
 0x30e   :  { %v1820_v30 = vadd.f32 %v2068_v21, %v1804_v56 }
 0x310   :  { %v1836_v27 = vmax.f32 %v1820_v30, 0.0 }
 0x311   :  { %v1763_v26 = vpop.f32.mrf.mxu3 }
 0x312   :  { %1852 = vst.msk [vmem:[%s3074_s10 + $0x70] sm:$0xff] %vm53_vm0, %v1836_v27  ;;  %v1785_v29 = vmul.f32 %v2913_v23, %v1763_v26 }
 0x314   :  { %v1805_v13 = vadd.f32 %v2918_v47, %v1785_v29 }
 0x316   :  { %v1821_v62 = vadd.f32 %v2069_v28, %v1805_v13 }
 0x318   :  { %v1837_v51 = vmax.f32 %v1821_v62, 0.0 }
 0x31a   :  { %1853 = vst.msk [vmem:[%s3074_s10 + $0x78] sm:$0xff] %vm53_vm0, %v1837_v51 }

</bundles_post_ra>
